<compile_context>
chip_gen: v5e
topology: v5e:2x2
jax: 0.10.0
libtpu: 0.0.40
codegen_flags: <defaults>
</compile_context>

<pallas_src>
import jax
import jax.numpy as jnp
import numpy as np
from jax.experimental import pallas as pl
from jax.experimental.pallas import tpu as pltpu

# ---- model hyperparameters (small, consistent with the module) --------------
INPUT_SIZE = 4
HIDDEN_SIZE = 32          # H ;  4H = 128 = one full lane dim
NUM_LAYERS = 2
NUM_KEYS = 16
NUM_TIME_BUCKET = 10
BATCH = 2
SEQ_LEN = 8

BP = 8                    # padded batch (full sublane group)
DP = 8                    # padded input feature dim
HEADS_PAD = 128           # fused heads padded to a full lane dim


def _deeplog_kernel(x_ref,      # [T*BP, DP]  bf16, time-major, batch/feature padded
                    w_ref,      # [136, 128]  f32 weight slab (see pack_params layout)
                    b_ref,      # [8, 128]    f32 bias slab (rows: b0, b1, b_heads)
                    out_ref):   # [BP, 128]   f32 fused lane-padded heads
    H = HIDDEN_SIZE
    G = 4 * H
    Bp = out_ref.shape[0]
    T = x_ref.shape[0] // Bp

    # ---- weights: slab loads at 8-row-aligned offsets, cast to bf16 once ----
    wih0 = w_ref[0:8, :].astype(jnp.bfloat16)        # (DP, 4H)   layer-0 input proj
    whh0 = w_ref[8:40, :].astype(jnp.bfloat16)       # (H, 4H)    layer-0 recurrent
    wih1 = w_ref[40:72, :].astype(jnp.bfloat16)      # (H, 4H)    layer-1 input proj
    whh1 = w_ref[72:104, :].astype(jnp.bfloat16)     # (H, 4H)    layer-1 recurrent
    whds = w_ref[104:136, :].astype(jnp.bfloat16)    # (H, 128)   fused, padded heads

    b_all = b_ref[...]                               # (8, 128) f32
    b1b = jnp.broadcast_to(b_all[1:2, :], (Bp, G))         # hoisted broadcasts
    bhd = jnp.broadcast_to(b_all[2:3, :], (Bp, HEADS_PAD))

    # ---- hoisted layer-0 input projection for all timesteps: one MXU op ----
    # (T*Bp, DP) @ (DP, 4H) + b0  ->  (T*Bp, 4H)   (b0 already gate-pre-scaled)
    xproj = (jnp.dot(x_ref[...], wih0, preferred_element_type=jnp.float32)
             + b_all[0:1, :])

    # ---- single-EUP activation constants (hoisted) ----
    # The 0.5 pre-scale for the sigmoid gates is folded into the weights/biases, so
    # per cell we need only ONE tanh plus a fused mul-add reconstruction.
    col = jax.lax.broadcasted_iota(jnp.int32, (Bp, G), 1)
    is_g = jnp.logical_and(col >= 2 * H, col < 3 * H)
    post_mul = jnp.where(is_g, jnp.float32(1.0), jnp.float32(0.5))
    post_add = jnp.where(is_g, jnp.float32(0.0), jnp.float32(0.5))

    def lstm_cell(gates, c):
        # gates columns (PyTorch order): i, f, g, o ; i/f/o columns hold 0.5*z.
        t = jnp.tanh(gates)                   # ONE EUP push over the whole 128-lane vreg
        act = t * post_mul + post_add         # sigmoid lanes: 0.5*t+0.5 ; tanh lanes: t
        i_g = act[:, 0 * H:1 * H]
        f_g = act[:, 1 * H:2 * H]
        g_g = act[:, 2 * H:3 * H]
        o_g = act[:, 3 * H:4 * H]
        c_new = f_g * c + i_g * g_g
        h_new = o_g * jnp.tanh(c_new)
        return h_new, c_new

    # h0 = c0 = zeros (matches torch.zeros initial state in forward()).
    zeros = jnp.zeros((Bp, H), jnp.float32)
    h0, c0 = zeros, zeros
    h1, c1 = zeros, zeros
    h1b = h1.astype(jnp.bfloat16)

    # Static unroll over time: state stays in vregs; no VMEM round-trips, no concat.
    for t in range(T):
        # layer 0: only the recurrent matmul is left inside the loop.
        g0 = xproj[t * Bp:(t + 1) * Bp, :] + jnp.dot(
            h0.astype(jnp.bfloat16), whh0, preferred_element_type=jnp.float32)
        h0, c0 = lstm_cell(g0, c0)
        h0b = h0.astype(jnp.bfloat16)

        # layer 1: split matmuls — h1@W_hh1 depends only on h1(t-1), so it sits off
        # the cell0 -> cell1 chain and the scheduler can overlap it.
        g1 = (jnp.dot(h0b, wih1, preferred_element_type=jnp.float32)
              + jnp.dot(h1b, whh1, preferred_element_type=jnp.float32)
              + b1b)
        h1, c1 = lstm_cell(g1, c1)
        h1b = h1.astype(jnp.bfloat16)

    # outlstm[:, -1, :] == h1 after the final step; fused fc/fc_time heads, one
    # lane-dense (Bp, 128) store.
    out_ref[...] = (jnp.dot(h1b, whds, preferred_element_type=jnp.float32) + bhd)


def pack_params(params):
    """One-time weight prep (hoisted out of the per-call wrapper).

    Returns two contiguous f32 slabs:
      w_slab [136,128]: rows 0:8   wih0 (input dim padded 4->8, gate-pre-scaled)
                        rows 8:40  whh0 (pre-scaled)
                        rows 40:72 wih1 (pre-scaled)
                        rows 72:104 whh1 (pre-scaled)
                        rows 104:136 fused heads weight padded to 128 lanes
      b_slab [8,128]:   row 0 b0 (pre-scaled), row 1 b1 (pre-scaled), row 2 b_heads.
    """
    H = HIDDEN_SIZE
    # sigmoid-via-tanh pre-scale: 0.5 on i/f/o gate columns, 1.0 on g columns.
    col = np.arange(4 * H)
    pre = np.where((col >= 2 * H) & (col < 3 * H), 1.0, 0.5).astype(np.float32)
    pre = jnp.asarray(pre)[None, :]                      # (1, 4H); exact (power of 2)

    wih0 = params["wih_t"][0] * pre                      # (D, 4H)
    whh0 = params["whh_t"][0] * pre                      # (H, 4H)
    wih1 = params["wih_t"][1] * pre                      # (H, 4H)
    whh1 = params["whh_t"][1] * pre                      # (H, 4H)
    b0 = params["bias"][0] * pre                         # (1, 4H)
    b1 = params["bias"][1] * pre                         # (1, 4H)

    wih0p = jnp.zeros((DP, 4 * H), jnp.float32).at[:INPUT_SIZE].set(wih0)

    w_heads = jnp.zeros((H, HEADS_PAD), jnp.float32)
    w_heads = w_heads.at[:, :NUM_KEYS].set(params["wfc_t"])
    w_heads = w_heads.at[:, NUM_KEYS:NUM_KEYS + NUM_TIME_BUCKET].set(params["wft_t"])
    b_heads = jnp.zeros((1, HEADS_PAD), jnp.float32)
    b_heads = b_heads.at[:, :NUM_KEYS].set(params["bfc"])
    b_heads = b_heads.at[:, NUM_KEYS:NUM_KEYS + NUM_TIME_BUCKET].set(params["bft"])

    w_slab = jnp.concatenate([wih0p, whh0, wih1, whh1, w_heads], axis=0)  # (136, 128)
    b_slab = jnp.zeros((8, HEADS_PAD), jnp.float32)
    b_slab = b_slab.at[0:1, :].set(b0)
    b_slab = b_slab.at[1:2, :].set(b1)
    b_slab = b_slab.at[2:3, :].set(b_heads)
    return {"w_slab": w_slab, "b_slab": b_slab}


@jax.jit
def deeplog_forward(x, packed):
    """x: [B, T, input_size] f32 -> (out [B, num_keys], out_time [B, num_time_bucket])."""
    B, T, D = x.shape
    # time-major, batch padded to a full sublane group (8), feature dim padded to 8;
    # flattened so the kernel can do one hoisted input-projection matmul.
    xt = jnp.transpose(x, (1, 0, 2))                               # (T, B, D)
    xt = jnp.pad(xt, ((0, 0), (0, BP - B), (0, DP - D)))           # (T, BP, DP)
    x2d = xt.reshape(T * BP, DP).astype(jnp.bfloat16)

    vmem = pl.BlockSpec(memory_space=pltpu.MemorySpace.VMEM)
    out_full = pl.pallas_call(
        _deeplog_kernel,
        out_shape=jax.ShapeDtypeStruct((BP, HEADS_PAD), jnp.float32),
        in_specs=[vmem, vmem, vmem],
        out_specs=vmem,
    )(x2d, packed["w_slab"], packed["b_slab"])

    out = out_full[:B, :NUM_KEYS]
    out_time = out_full[:B, NUM_KEYS:NUM_KEYS + NUM_TIME_BUCKET]
    return out, out_time


def init_params(key):
    """Deterministic init mirroring nn.LSTM / nn.Linear parameter shapes (f32)."""
    H, D = HIDDEN_SIZE, INPUT_SIZE
    k = 1.0 / np.sqrt(H)
    keys = jax.random.split(key, 4 * NUM_LAYERS + 4)
    ki = iter(keys)

    wih_t, whh_t, bias = [], [], []
    for l in range(NUM_LAYERS):
        in_dim = D if l == 0 else H
        w_ih = jax.random.uniform(next(ki), (4 * H, in_dim), jnp.float32, -k, k)
        w_hh = jax.random.uniform(next(ki), (4 * H, H), jnp.float32, -k, k)
        b_ih = jax.random.uniform(next(ki), (4 * H,), jnp.float32, -k, k)
        b_hh = jax.random.uniform(next(ki), (4 * H,), jnp.float32, -k, k)
        wih_t.append(w_ih.T)                          # [in_dim, 4H]
        whh_t.append(w_hh.T)                          # [H, 4H]
        bias.append((b_ih + b_hh).reshape(1, 4 * H))  # [1, 4H]

    w_fc = jax.random.uniform(next(ki), (NUM_KEYS, H), jnp.float32, -k, k)
    b_fc = jax.random.uniform(next(ki), (NUM_KEYS,), jnp.float32, -k, k)
    w_ft = jax.random.uniform(next(ki), (NUM_TIME_BUCKET, H), jnp.float32, -k, k)
    b_ft = jax.random.uniform(next(ki), (NUM_TIME_BUCKET,), jnp.float32, -k, k)

    return {
        "wih_t": wih_t, "whh_t": whh_t, "bias": bias,
        "wfc_t": w_fc.T, "bfc": b_fc.reshape(1, -1),
        "wft_t": w_ft.T, "bft": b_ft.reshape(1, -1),
    }


def reference_forward(x, params):
    """Pure-JAX f32 reference of the module's forward pass (correctness check)."""
    B, T, _ = x.shape
    H = HIDDEN_SIZE
    h = [jnp.zeros((B, H), jnp.float32) for _ in range(NUM_LAYERS)]
    c = [jnp.zeros((B, H), jnp.float32) for _ in range(NUM_LAYERS)]
    for t in range(T):
        inp = x[:, t, :]
        for l in range(NUM_LAYERS):
            gates = inp @ params["wih_t"][l] + h[l] @ params["whh_t"][l] + params["bias"][l]
            i_g = jax.nn.sigmoid(gates[:, 0 * H:1 * H])
            f_g = jax.nn.sigmoid(gates[:, 1 * H:2 * H])
            g_g = jnp.tanh(gates[:, 2 * H:3 * H])
            o_g = jax.nn.sigmoid(gates[:, 3 * H:4 * H])
            c[l] = f_g * c[l] + i_g * g_g
            h[l] = o_g * jnp.tanh(c[l])
            inp = h[l]
    h_last = h[-1]
    out = h_last @ params["wfc_t"] + params["bfc"]
    out_time = h_last @ params["wft_t"] + params["bft"]
    return out, out_time


if __name__ == "__main__":
    key = jax.random.PRNGKey(0)
    pkey, xkey = jax.random.split(key)
    params = init_params(pkey)
    packed = pack_params(params)       # one-time weight prep (hoisted out of the call)
    x = jax.random.normal(xkey, (BATCH, SEQ_LEN, INPUT_SIZE), jnp.float32)

    out, out_time = deeplog_forward(x, packed)
    jax.block_until_ready((out, out_time))

    ref_out, ref_out_time = reference_forward(x, params)
    # Tolerance loosened vs the pure-f32 version: MXU operands are bf16 (f32 accumulate).
    np.testing.assert_allclose(np.asarray(out), np.asarray(ref_out), rtol=2e-2, atol=2e-2)
    np.testing.assert_allclose(np.asarray(out_time), np.asarray(ref_out_time),
                               rtol=2e-2, atol=2e-2)
    assert out.shape == (BATCH, NUM_KEYS) and out_time.shape == (BATCH, NUM_TIME_BUCKET)

    print("KERNEL_OK")
</pallas_src>

<mosaic_0001>
module attributes {stable_mosaic.version = 11 : i64} {
  func.func @_deeplog_kernel(%arg0: memref<64x8xbf16, #tpu.memory_space<vmem>>, %arg1: memref<136x128xf32, #tpu.memory_space<vmem>>, %arg2: memref<8x128xf32, #tpu.memory_space<vmem>>, %arg3: memref<8x128xf32, #tpu.memory_space<vmem>>) attributes {dimension_semantics = [], scalar_prefetch = 0 : i64, scratch_operands = 0 : i64, tpu.core_type = #tpu.core_type<tc>} {
    %c0 = arith.constant 0 : index
    %c0_0 = arith.constant 0 : index
    %0 = vector.load %arg1[%c0, %c0_0] : memref<136x128xf32, #tpu.memory_space<vmem>>, vector<8x128xf32>
    %1 = arith.truncf %0 : vector<8x128xf32> to vector<8x128xbf16>
    %c8 = arith.constant 8 : index
    %c0_1 = arith.constant 0 : index
    %2 = vector.load %arg1[%c8, %c0_1] : memref<136x128xf32, #tpu.memory_space<vmem>>, vector<32x128xf32>
    %3 = arith.truncf %2 : vector<32x128xf32> to vector<32x128xbf16>
    %c40 = arith.constant 40 : index
    %c0_2 = arith.constant 0 : index
    %4 = vector.load %arg1[%c40, %c0_2] : memref<136x128xf32, #tpu.memory_space<vmem>>, vector<32x128xf32>
    %5 = arith.truncf %4 : vector<32x128xf32> to vector<32x128xbf16>
    %c72 = arith.constant 72 : index
    %c0_3 = arith.constant 0 : index
    %6 = vector.load %arg1[%c72, %c0_3] : memref<136x128xf32, #tpu.memory_space<vmem>>, vector<32x128xf32>
    %7 = arith.truncf %6 : vector<32x128xf32> to vector<32x128xbf16>
    %c104 = arith.constant 104 : index
    %c0_4 = arith.constant 0 : index
    %8 = vector.load %arg1[%c104, %c0_4] : memref<136x128xf32, #tpu.memory_space<vmem>>, vector<32x128xf32>
    %9 = arith.truncf %8 : vector<32x128xf32> to vector<32x128xbf16>
    %c0_5 = arith.constant 0 : index
    %c0_6 = arith.constant 0 : index
    %10 = vector.load %arg2[%c0_5, %c0_6] : memref<8x128xf32, #tpu.memory_space<vmem>>, vector<8x128xf32>
    %11 = vector.extract_strided_slice %10 {offsets = [1, 0], sizes = [1, 128], strides = [1, 1]} : vector<8x128xf32> to vector<1x128xf32>
    %12 = vector.shape_cast %11 : vector<1x128xf32> to vector<1x128xf32>
    %13 = vector.broadcast %12 : vector<1x128xf32> to vector<8x128xf32>
    %14 = vector.extract_strided_slice %10 {offsets = [2, 0], sizes = [1, 128], strides = [1, 1]} : vector<8x128xf32> to vector<1x128xf32>
    %15 = vector.shape_cast %14 : vector<1x128xf32> to vector<1x128xf32>
    %16 = vector.broadcast %15 : vector<1x128xf32> to vector<8x128xf32>
    %c0_7 = arith.constant 0 : index
    %c0_8 = arith.constant 0 : index
    %17 = vector.load %arg0[%c0_7, %c0_8] : memref<64x8xbf16, #tpu.memory_space<vmem>>, vector<64x8xbf16>
    %cst = arith.constant dense<0.000000e+00> : vector<64x128xf32>
    %18 = tpu.matmul %17, %1, %cst {dimension_numbers = #tpu.dot_dimension_numbers<[1], [0], [0], [1], [0, 0, 1, 1], [], []>} : vector<64x8xbf16>, vector<8x128xbf16>, vector<64x128xf32> -> vector<64x128xf32>
    %19 = vector.extract_strided_slice %10 {offsets = [0, 0], sizes = [1, 128], strides = [1, 1]} : vector<8x128xf32> to vector<1x128xf32>
    %20 = vector.broadcast %19 : vector<1x128xf32> to vector<64x128xf32>
    %21 = arith.addf %18, %20 : vector<64x128xf32>
    %22 = tpu.iota {dimensions = array<i32: 1>} : vector<8x128xi32>
    %c64_i32 = arith.constant 64 : i32
    %23 = vector.broadcast %c64_i32 : i32 to vector<8x128xi32>
    %24 = arith.cmpi sge, %22, %23 : vector<8x128xi32>
    %c96_i32 = arith.constant 96 : i32
    %25 = vector.broadcast %c96_i32 : i32 to vector<8x128xi32>
    %26 = arith.cmpi slt, %22, %25 : vector<8x128xi32>
    %27 = arith.andi %24, %26 : vector<8x128xi1>
    %cst_9 = arith.constant 1.000000e+00 : f32
    %cst_10 = arith.constant 5.000000e-01 : f32
    %28 = vector.broadcast %cst_9 : f32 to vector<8x128xf32>
    %29 = vector.broadcast %cst_10 : f32 to vector<8x128xf32>
    %30 = arith.select %27, %28, %29 : vector<8x128xi1>, vector<8x128xf32>
    %cst_11 = arith.constant 0.000000e+00 : f32
    %cst_12 = arith.constant 5.000000e-01 : f32
    %31 = vector.broadcast %cst_11 : f32 to vector<8x128xf32>
    %32 = vector.broadcast %cst_12 : f32 to vector<8x128xf32>
    %33 = arith.select %27, %31, %32 : vector<8x128xi1>, vector<8x128xf32>
    %cst_13 = arith.constant 0.000000e+00 : f32
    %34 = vector.broadcast %cst_13 : f32 to vector<8x32xf32>
    %35 = arith.truncf %34 : vector<8x32xf32> to vector<8x32xbf16>
    %36 = vector.extract_strided_slice %21 {offsets = [0, 0], sizes = [8, 128], strides = [1, 1]} : vector<64x128xf32> to vector<8x128xf32>
    %37 = arith.truncf %34 : vector<8x32xf32> to vector<8x32xbf16>
    %cst_14 = arith.constant dense<0.000000e+00> : vector<8x128xf32>
    %38 = tpu.matmul %37, %3, %cst_14 {dimension_numbers = #tpu.dot_dimension_numbers<[1], [0], [0], [1], [0, 0, 1, 1], [], []>} : vector<8x32xbf16>, vector<32x128xbf16>, vector<8x128xf32> -> vector<8x128xf32>
    %39 = arith.addf %36, %38 : vector<8x128xf32>
    %40 = math.tanh %39 : vector<8x128xf32>
    %41 = arith.mulf %40, %30 : vector<8x128xf32>
    %42 = arith.addf %41, %33 : vector<8x128xf32>
    %43 = vector.extract_strided_slice %42 {offsets = [0, 0], sizes = [8, 32], strides = [1, 1]} : vector<8x128xf32> to vector<8x32xf32>
    %44 = vector.extract_strided_slice %42 {offsets = [0, 32], sizes = [8, 32], strides = [1, 1]} : vector<8x128xf32> to vector<8x32xf32>
    %45 = vector.extract_strided_slice %42 {offsets = [0, 64], sizes = [8, 32], strides = [1, 1]} : vector<8x128xf32> to vector<8x32xf32>
    %46 = vector.extract_strided_slice %42 {offsets = [0, 96], sizes = [8, 32], strides = [1, 1]} : vector<8x128xf32> to vector<8x32xf32>
    %47 = arith.mulf %44, %34 : vector<8x32xf32>
    %48 = arith.mulf %43, %45 : vector<8x32xf32>
    %49 = arith.addf %47, %48 : vector<8x32xf32>
    %50 = math.tanh %49 : vector<8x32xf32>
    %51 = arith.mulf %46, %50 : vector<8x32xf32>
    %52 = arith.truncf %51 : vector<8x32xf32> to vector<8x32xbf16>
    %cst_15 = arith.constant dense<0.000000e+00> : vector<8x128xf32>
    %53 = tpu.matmul %52, %5, %cst_15 {dimension_numbers = #tpu.dot_dimension_numbers<[1], [0], [0], [1], [0, 0, 1, 1], [], []>} : vector<8x32xbf16>, vector<32x128xbf16>, vector<8x128xf32> -> vector<8x128xf32>
    %cst_16 = arith.constant dense<0.000000e+00> : vector<8x128xf32>
    %54 = tpu.matmul %35, %7, %cst_16 {dimension_numbers = #tpu.dot_dimension_numbers<[1], [0], [0], [1], [0, 0, 1, 1], [], []>} : vector<8x32xbf16>, vector<32x128xbf16>, vector<8x128xf32> -> vector<8x128xf32>
    %55 = arith.addf %53, %54 : vector<8x128xf32>
    %56 = arith.addf %55, %13 : vector<8x128xf32>
    %57 = math.tanh %56 : vector<8x128xf32>
    %58 = arith.mulf %57, %30 : vector<8x128xf32>
    %59 = arith.addf %58, %33 : vector<8x128xf32>
    %60 = vector.extract_strided_slice %59 {offsets = [0, 0], sizes = [8, 32], strides = [1, 1]} : vector<8x128xf32> to vector<8x32xf32>
    %61 = vector.extract_strided_slice %59 {offsets = [0, 32], sizes = [8, 32], strides = [1, 1]} : vector<8x128xf32> to vector<8x32xf32>
    %62 = vector.extract_strided_slice %59 {offsets = [0, 64], sizes = [8, 32], strides = [1, 1]} : vector<8x128xf32> to vector<8x32xf32>
    %63 = vector.extract_strided_slice %59 {offsets = [0, 96], sizes = [8, 32], strides = [1, 1]} : vector<8x128xf32> to vector<8x32xf32>
    %64 = arith.mulf %61, %34 : vector<8x32xf32>
    %65 = arith.mulf %60, %62 : vector<8x32xf32>
    %66 = arith.addf %64, %65 : vector<8x32xf32>
    %67 = math.tanh %66 : vector<8x32xf32>
    %68 = arith.mulf %63, %67 : vector<8x32xf32>
    %69 = arith.truncf %68 : vector<8x32xf32> to vector<8x32xbf16>
    %70 = vector.extract_strided_slice %21 {offsets = [8, 0], sizes = [8, 128], strides = [1, 1]} : vector<64x128xf32> to vector<8x128xf32>
    %71 = arith.truncf %51 : vector<8x32xf32> to vector<8x32xbf16>
    %cst_17 = arith.constant dense<0.000000e+00> : vector<8x128xf32>
    %72 = tpu.matmul %71, %3, %cst_17 {dimension_numbers = #tpu.dot_dimension_numbers<[1], [0], [0], [1], [0, 0, 1, 1], [], []>} : vector<8x32xbf16>, vector<32x128xbf16>, vector<8x128xf32> -> vector<8x128xf32>
    %73 = arith.addf %70, %72 : vector<8x128xf32>
    %74 = math.tanh %73 : vector<8x128xf32>
    %75 = arith.mulf %74, %30 : vector<8x128xf32>
    %76 = arith.addf %75, %33 : vector<8x128xf32>
    %77 = vector.extract_strided_slice %76 {offsets = [0, 0], sizes = [8, 32], strides = [1, 1]} : vector<8x128xf32> to vector<8x32xf32>
    %78 = vector.extract_strided_slice %76 {offsets = [0, 32], sizes = [8, 32], strides = [1, 1]} : vector<8x128xf32> to vector<8x32xf32>
    %79 = vector.extract_strided_slice %76 {offsets = [0, 64], sizes = [8, 32], strides = [1, 1]} : vector<8x128xf32> to vector<8x32xf32>
    %80 = vector.extract_strided_slice %76 {offsets = [0, 96], sizes = [8, 32], strides = [1, 1]} : vector<8x128xf32> to vector<8x32xf32>
    %81 = arith.mulf %78, %49 : vector<8x32xf32>
    %82 = arith.mulf %77, %79 : vector<8x32xf32>
    %83 = arith.addf %81, %82 : vector<8x32xf32>
    %84 = math.tanh %83 : vector<8x32xf32>
    %85 = arith.mulf %80, %84 : vector<8x32xf32>
    %86 = arith.truncf %85 : vector<8x32xf32> to vector<8x32xbf16>
    %cst_18 = arith.constant dense<0.000000e+00> : vector<8x128xf32>
    %87 = tpu.matmul %86, %5, %cst_18 {dimension_numbers = #tpu.dot_dimension_numbers<[1], [0], [0], [1], [0, 0, 1, 1], [], []>} : vector<8x32xbf16>, vector<32x128xbf16>, vector<8x128xf32> -> vector<8x128xf32>
    %cst_19 = arith.constant dense<0.000000e+00> : vector<8x128xf32>
    %88 = tpu.matmul %69, %7, %cst_19 {dimension_numbers = #tpu.dot_dimension_numbers<[1], [0], [0], [1], [0, 0, 1, 1], [], []>} : vector<8x32xbf16>, vector<32x128xbf16>, vector<8x128xf32> -> vector<8x128xf32>
    %89 = arith.addf %87, %88 : vector<8x128xf32>
    %90 = arith.addf %89, %13 : vector<8x128xf32>
    %91 = math.tanh %90 : vector<8x128xf32>
    %92 = arith.mulf %91, %30 : vector<8x128xf32>
    %93 = arith.addf %92, %33 : vector<8x128xf32>
    %94 = vector.extract_strided_slice %93 {offsets = [0, 0], sizes = [8, 32], strides = [1, 1]} : vector<8x128xf32> to vector<8x32xf32>
    %95 = vector.extract_strided_slice %93 {offsets = [0, 32], sizes = [8, 32], strides = [1, 1]} : vector<8x128xf32> to vector<8x32xf32>
    %96 = vector.extract_strided_slice %93 {offsets = [0, 64], sizes = [8, 32], strides = [1, 1]} : vector<8x128xf32> to vector<8x32xf32>
    %97 = vector.extract_strided_slice %93 {offsets = [0, 96], sizes = [8, 32], strides = [1, 1]} : vector<8x128xf32> to vector<8x32xf32>
    %98 = arith.mulf %95, %66 : vector<8x32xf32>
    %99 = arith.mulf %94, %96 : vector<8x32xf32>
    %100 = arith.addf %98, %99 : vector<8x32xf32>
    %101 = math.tanh %100 : vector<8x32xf32>
    %102 = arith.mulf %97, %101 : vector<8x32xf32>
    %103 = arith.truncf %102 : vector<8x32xf32> to vector<8x32xbf16>
    %104 = vector.extract_strided_slice %21 {offsets = [16, 0], sizes = [8, 128], strides = [1, 1]} : vector<64x128xf32> to vector<8x128xf32>
    %105 = arith.truncf %85 : vector<8x32xf32> to vector<8x32xbf16>
    %cst_20 = arith.constant dense<0.000000e+00> : vector<8x128xf32>
    %106 = tpu.matmul %105, %3, %cst_20 {dimension_numbers = #tpu.dot_dimension_numbers<[1], [0], [0], [1], [0, 0, 1, 1], [], []>} : vector<8x32xbf16>, vector<32x128xbf16>, vector<8x128xf32> -> vector<8x128xf32>
    %107 = arith.addf %104, %106 : vector<8x128xf32>
    %108 = math.tanh %107 : vector<8x128xf32>
    %109 = arith.mulf %108, %30 : vector<8x128xf32>
    %110 = arith.addf %109, %33 : vector<8x128xf32>
    %111 = vector.extract_strided_slice %110 {offsets = [0, 0], sizes = [8, 32], strides = [1, 1]} : vector<8x128xf32> to vector<8x32xf32>
    %112 = vector.extract_strided_slice %110 {offsets = [0, 32], sizes = [8, 32], strides = [1, 1]} : vector<8x128xf32> to vector<8x32xf32>
    %113 = vector.extract_strided_slice %110 {offsets = [0, 64], sizes = [8, 32], strides = [1, 1]} : vector<8x128xf32> to vector<8x32xf32>
    %114 = vector.extract_strided_slice %110 {offsets = [0, 96], sizes = [8, 32], strides = [1, 1]} : vector<8x128xf32> to vector<8x32xf32>
    %115 = arith.mulf %112, %83 : vector<8x32xf32>
    %116 = arith.mulf %111, %113 : vector<8x32xf32>
    %117 = arith.addf %115, %116 : vector<8x32xf32>
    %118 = math.tanh %117 : vector<8x32xf32>
    %119 = arith.mulf %114, %118 : vector<8x32xf32>
    %120 = arith.truncf %119 : vector<8x32xf32> to vector<8x32xbf16>
    %cst_21 = arith.constant dense<0.000000e+00> : vector<8x128xf32>
    %121 = tpu.matmul %120, %5, %cst_21 {dimension_numbers = #tpu.dot_dimension_numbers<[1], [0], [0], [1], [0, 0, 1, 1], [], []>} : vector<8x32xbf16>, vector<32x128xbf16>, vector<8x128xf32> -> vector<8x128xf32>
    %cst_22 = arith.constant dense<0.000000e+00> : vector<8x128xf32>
    %122 = tpu.matmul %103, %7, %cst_22 {dimension_numbers = #tpu.dot_dimension_numbers<[1], [0], [0], [1], [0, 0, 1, 1], [], []>} : vector<8x32xbf16>, vector<32x128xbf16>, vector<8x128xf32> -> vector<8x128xf32>
    %123 = arith.addf %121, %122 : vector<8x128xf32>
    %124 = arith.addf %123, %13 : vector<8x128xf32>
    %125 = math.tanh %124 : vector<8x128xf32>
    %126 = arith.mulf %125, %30 : vector<8x128xf32>
    %127 = arith.addf %126, %33 : vector<8x128xf32>
    %128 = vector.extract_strided_slice %127 {offsets = [0, 0], sizes = [8, 32], strides = [1, 1]} : vector<8x128xf32> to vector<8x32xf32>
    %129 = vector.extract_strided_slice %127 {offsets = [0, 32], sizes = [8, 32], strides = [1, 1]} : vector<8x128xf32> to vector<8x32xf32>
    %130 = vector.extract_strided_slice %127 {offsets = [0, 64], sizes = [8, 32], strides = [1, 1]} : vector<8x128xf32> to vector<8x32xf32>
    %131 = vector.extract_strided_slice %127 {offsets = [0, 96], sizes = [8, 32], strides = [1, 1]} : vector<8x128xf32> to vector<8x32xf32>
    %132 = arith.mulf %129, %100 : vector<8x32xf32>
    %133 = arith.mulf %128, %130 : vector<8x32xf32>
    %134 = arith.addf %132, %133 : vector<8x32xf32>
    %135 = math.tanh %134 : vector<8x32xf32>
    %136 = arith.mulf %131, %135 : vector<8x32xf32>
    %137 = arith.truncf %136 : vector<8x32xf32> to vector<8x32xbf16>
    %138 = vector.extract_strided_slice %21 {offsets = [24, 0], sizes = [8, 128], strides = [1, 1]} : vector<64x128xf32> to vector<8x128xf32>
    %139 = arith.truncf %119 : vector<8x32xf32> to vector<8x32xbf16>
    %cst_23 = arith.constant dense<0.000000e+00> : vector<8x128xf32>
    %140 = tpu.matmul %139, %3, %cst_23 {dimension_numbers = #tpu.dot_dimension_numbers<[1], [0], [0], [1], [0, 0, 1, 1], [], []>} : vector<8x32xbf16>, vector<32x128xbf16>, vector<8x128xf32> -> vector<8x128xf32>
    %141 = arith.addf %138, %140 : vector<8x128xf32>
    %142 = math.tanh %141 : vector<8x128xf32>
    %143 = arith.mulf %142, %30 : vector<8x128xf32>
    %144 = arith.addf %143, %33 : vector<8x128xf32>
    %145 = vector.extract_strided_slice %144 {offsets = [0, 0], sizes = [8, 32], strides = [1, 1]} : vector<8x128xf32> to vector<8x32xf32>
    %146 = vector.extract_strided_slice %144 {offsets = [0, 32], sizes = [8, 32], strides = [1, 1]} : vector<8x128xf32> to vector<8x32xf32>
    %147 = vector.extract_strided_slice %144 {offsets = [0, 64], sizes = [8, 32], strides = [1, 1]} : vector<8x128xf32> to vector<8x32xf32>
    %148 = vector.extract_strided_slice %144 {offsets = [0, 96], sizes = [8, 32], strides = [1, 1]} : vector<8x128xf32> to vector<8x32xf32>
    %149 = arith.mulf %146, %117 : vector<8x32xf32>
    %150 = arith.mulf %145, %147 : vector<8x32xf32>
    %151 = arith.addf %149, %150 : vector<8x32xf32>
    %152 = math.tanh %151 : vector<8x32xf32>
    %153 = arith.mulf %148, %152 : vector<8x32xf32>
    %154 = arith.truncf %153 : vector<8x32xf32> to vector<8x32xbf16>
    %cst_24 = arith.constant dense<0.000000e+00> : vector<8x128xf32>
    %155 = tpu.matmul %154, %5, %cst_24 {dimension_numbers = #tpu.dot_dimension_numbers<[1], [0], [0], [1], [0, 0, 1, 1], [], []>} : vector<8x32xbf16>, vector<32x128xbf16>, vector<8x128xf32> -> vector<8x128xf32>
    %cst_25 = arith.constant dense<0.000000e+00> : vector<8x128xf32>
    %156 = tpu.matmul %137, %7, %cst_25 {dimension_numbers = #tpu.dot_dimension_numbers<[1], [0], [0], [1], [0, 0, 1, 1], [], []>} : vector<8x32xbf16>, vector<32x128xbf16>, vector<8x128xf32> -> vector<8x128xf32>
    %157 = arith.addf %155, %156 : vector<8x128xf32>
    %158 = arith.addf %157, %13 : vector<8x128xf32>
    %159 = math.tanh %158 : vector<8x128xf32>
    %160 = arith.mulf %159, %30 : vector<8x128xf32>
    %161 = arith.addf %160, %33 : vector<8x128xf32>
    %162 = vector.extract_strided_slice %161 {offsets = [0, 0], sizes = [8, 32], strides = [1, 1]} : vector<8x128xf32> to vector<8x32xf32>
    %163 = vector.extract_strided_slice %161 {offsets = [0, 32], sizes = [8, 32], strides = [1, 1]} : vector<8x128xf32> to vector<8x32xf32>
    %164 = vector.extract_strided_slice %161 {offsets = [0, 64], sizes = [8, 32], strides = [1, 1]} : vector<8x128xf32> to vector<8x32xf32>
    %165 = vector.extract_strided_slice %161 {offsets = [0, 96], sizes = [8, 32], strides = [1, 1]} : vector<8x128xf32> to vector<8x32xf32>
    %166 = arith.mulf %163, %134 : vector<8x32xf32>
    %167 = arith.mulf %162, %164 : vector<8x32xf32>
    %168 = arith.addf %166, %167 : vector<8x32xf32>
    %169 = math.tanh %168 : vector<8x32xf32>
    %170 = arith.mulf %165, %169 : vector<8x32xf32>
    %171 = arith.truncf %170 : vector<8x32xf32> to vector<8x32xbf16>
    %172 = vector.extract_strided_slice %21 {offsets = [32, 0], sizes = [8, 128], strides = [1, 1]} : vector<64x128xf32> to vector<8x128xf32>
    %173 = arith.truncf %153 : vector<8x32xf32> to vector<8x32xbf16>
    %cst_26 = arith.constant dense<0.000000e+00> : vector<8x128xf32>
    %174 = tpu.matmul %173, %3, %cst_26 {dimension_numbers = #tpu.dot_dimension_numbers<[1], [0], [0], [1], [0, 0, 1, 1], [], []>} : vector<8x32xbf16>, vector<32x128xbf16>, vector<8x128xf32> -> vector<8x128xf32>
    %175 = arith.addf %172, %174 : vector<8x128xf32>
    %176 = math.tanh %175 : vector<8x128xf32>
    %177 = arith.mulf %176, %30 : vector<8x128xf32>
    %178 = arith.addf %177, %33 : vector<8x128xf32>
    %179 = vector.extract_strided_slice %178 {offsets = [0, 0], sizes = [8, 32], strides = [1, 1]} : vector<8x128xf32> to vector<8x32xf32>
    %180 = vector.extract_strided_slice %178 {offsets = [0, 32], sizes = [8, 32], strides = [1, 1]} : vector<8x128xf32> to vector<8x32xf32>
    %181 = vector.extract_strided_slice %178 {offsets = [0, 64], sizes = [8, 32], strides = [1, 1]} : vector<8x128xf32> to vector<8x32xf32>
    %182 = vector.extract_strided_slice %178 {offsets = [0, 96], sizes = [8, 32], strides = [1, 1]} : vector<8x128xf32> to vector<8x32xf32>
    %183 = arith.mulf %180, %151 : vector<8x32xf32>
    %184 = arith.mulf %179, %181 : vector<8x32xf32>
    %185 = arith.addf %183, %184 : vector<8x32xf32>
    %186 = math.tanh %185 : vector<8x32xf32>
    %187 = arith.mulf %182, %186 : vector<8x32xf32>
    %188 = arith.truncf %187 : vector<8x32xf32> to vector<8x32xbf16>
    %cst_27 = arith.constant dense<0.000000e+00> : vector<8x128xf32>
    %189 = tpu.matmul %188, %5, %cst_27 {dimension_numbers = #tpu.dot_dimension_numbers<[1], [0], [0], [1], [0, 0, 1, 1], [], []>} : vector<8x32xbf16>, vector<32x128xbf16>, vector<8x128xf32> -> vector<8x128xf32>
    %cst_28 = arith.constant dense<0.000000e+00> : vector<8x128xf32>
    %190 = tpu.matmul %171, %7, %cst_28 {dimension_numbers = #tpu.dot_dimension_numbers<[1], [0], [0], [1], [0, 0, 1, 1], [], []>} : vector<8x32xbf16>, vector<32x128xbf16>, vector<8x128xf32> -> vector<8x128xf32>
    %191 = arith.addf %189, %190 : vector<8x128xf32>
    %192 = arith.addf %191, %13 : vector<8x128xf32>
    %193 = math.tanh %192 : vector<8x128xf32>
    %194 = arith.mulf %193, %30 : vector<8x128xf32>
    %195 = arith.addf %194, %33 : vector<8x128xf32>
    %196 = vector.extract_strided_slice %195 {offsets = [0, 0], sizes = [8, 32], strides = [1, 1]} : vector<8x128xf32> to vector<8x32xf32>
    %197 = vector.extract_strided_slice %195 {offsets = [0, 32], sizes = [8, 32], strides = [1, 1]} : vector<8x128xf32> to vector<8x32xf32>
    %198 = vector.extract_strided_slice %195 {offsets = [0, 64], sizes = [8, 32], strides = [1, 1]} : vector<8x128xf32> to vector<8x32xf32>
    %199 = vector.extract_strided_slice %195 {offsets = [0, 96], sizes = [8, 32], strides = [1, 1]} : vector<8x128xf32> to vector<8x32xf32>
    %200 = arith.mulf %197, %168 : vector<8x32xf32>
    %201 = arith.mulf %196, %198 : vector<8x32xf32>
    %202 = arith.addf %200, %201 : vector<8x32xf32>
    %203 = math.tanh %202 : vector<8x32xf32>
    %204 = arith.mulf %199, %203 : vector<8x32xf32>
    %205 = arith.truncf %204 : vector<8x32xf32> to vector<8x32xbf16>
    %206 = vector.extract_strided_slice %21 {offsets = [40, 0], sizes = [8, 128], strides = [1, 1]} : vector<64x128xf32> to vector<8x128xf32>
    %207 = arith.truncf %187 : vector<8x32xf32> to vector<8x32xbf16>
    %cst_29 = arith.constant dense<0.000000e+00> : vector<8x128xf32>
    %208 = tpu.matmul %207, %3, %cst_29 {dimension_numbers = #tpu.dot_dimension_numbers<[1], [0], [0], [1], [0, 0, 1, 1], [], []>} : vector<8x32xbf16>, vector<32x128xbf16>, vector<8x128xf32> -> vector<8x128xf32>
    %209 = arith.addf %206, %208 : vector<8x128xf32>
    %210 = math.tanh %209 : vector<8x128xf32>
    %211 = arith.mulf %210, %30 : vector<8x128xf32>
    %212 = arith.addf %211, %33 : vector<8x128xf32>
    %213 = vector.extract_strided_slice %212 {offsets = [0, 0], sizes = [8, 32], strides = [1, 1]} : vector<8x128xf32> to vector<8x32xf32>
    %214 = vector.extract_strided_slice %212 {offsets = [0, 32], sizes = [8, 32], strides = [1, 1]} : vector<8x128xf32> to vector<8x32xf32>
    %215 = vector.extract_strided_slice %212 {offsets = [0, 64], sizes = [8, 32], strides = [1, 1]} : vector<8x128xf32> to vector<8x32xf32>
    %216 = vector.extract_strided_slice %212 {offsets = [0, 96], sizes = [8, 32], strides = [1, 1]} : vector<8x128xf32> to vector<8x32xf32>
    %217 = arith.mulf %214, %185 : vector<8x32xf32>
    %218 = arith.mulf %213, %215 : vector<8x32xf32>
    %219 = arith.addf %217, %218 : vector<8x32xf32>
    %220 = math.tanh %219 : vector<8x32xf32>
    %221 = arith.mulf %216, %220 : vector<8x32xf32>
    %222 = arith.truncf %221 : vector<8x32xf32> to vector<8x32xbf16>
    %cst_30 = arith.constant dense<0.000000e+00> : vector<8x128xf32>
    %223 = tpu.matmul %222, %5, %cst_30 {dimension_numbers = #tpu.dot_dimension_numbers<[1], [0], [0], [1], [0, 0, 1, 1], [], []>} : vector<8x32xbf16>, vector<32x128xbf16>, vector<8x128xf32> -> vector<8x128xf32>
    %cst_31 = arith.constant dense<0.000000e+00> : vector<8x128xf32>
    %224 = tpu.matmul %205, %7, %cst_31 {dimension_numbers = #tpu.dot_dimension_numbers<[1], [0], [0], [1], [0, 0, 1, 1], [], []>} : vector<8x32xbf16>, vector<32x128xbf16>, vector<8x128xf32> -> vector<8x128xf32>
    %225 = arith.addf %223, %224 : vector<8x128xf32>
    %226 = arith.addf %225, %13 : vector<8x128xf32>
    %227 = math.tanh %226 : vector<8x128xf32>
    %228 = arith.mulf %227, %30 : vector<8x128xf32>
    %229 = arith.addf %228, %33 : vector<8x128xf32>
    %230 = vector.extract_strided_slice %229 {offsets = [0, 0], sizes = [8, 32], strides = [1, 1]} : vector<8x128xf32> to vector<8x32xf32>
    %231 = vector.extract_strided_slice %229 {offsets = [0, 32], sizes = [8, 32], strides = [1, 1]} : vector<8x128xf32> to vector<8x32xf32>
    %232 = vector.extract_strided_slice %229 {offsets = [0, 64], sizes = [8, 32], strides = [1, 1]} : vector<8x128xf32> to vector<8x32xf32>
    %233 = vector.extract_strided_slice %229 {offsets = [0, 96], sizes = [8, 32], strides = [1, 1]} : vector<8x128xf32> to vector<8x32xf32>
    %234 = arith.mulf %231, %202 : vector<8x32xf32>
    %235 = arith.mulf %230, %232 : vector<8x32xf32>
    %236 = arith.addf %234, %235 : vector<8x32xf32>
    %237 = math.tanh %236 : vector<8x32xf32>
    %238 = arith.mulf %233, %237 : vector<8x32xf32>
    %239 = arith.truncf %238 : vector<8x32xf32> to vector<8x32xbf16>
    %240 = vector.extract_strided_slice %21 {offsets = [48, 0], sizes = [8, 128], strides = [1, 1]} : vector<64x128xf32> to vector<8x128xf32>
    %241 = arith.truncf %221 : vector<8x32xf32> to vector<8x32xbf16>
    %cst_32 = arith.constant dense<0.000000e+00> : vector<8x128xf32>
    %242 = tpu.matmul %241, %3, %cst_32 {dimension_numbers = #tpu.dot_dimension_numbers<[1], [0], [0], [1], [0, 0, 1, 1], [], []>} : vector<8x32xbf16>, vector<32x128xbf16>, vector<8x128xf32> -> vector<8x128xf32>
    %243 = arith.addf %240, %242 : vector<8x128xf32>
    %244 = math.tanh %243 : vector<8x128xf32>
    %245 = arith.mulf %244, %30 : vector<8x128xf32>
    %246 = arith.addf %245, %33 : vector<8x128xf32>
    %247 = vector.extract_strided_slice %246 {offsets = [0, 0], sizes = [8, 32], strides = [1, 1]} : vector<8x128xf32> to vector<8x32xf32>
    %248 = vector.extract_strided_slice %246 {offsets = [0, 32], sizes = [8, 32], strides = [1, 1]} : vector<8x128xf32> to vector<8x32xf32>
    %249 = vector.extract_strided_slice %246 {offsets = [0, 64], sizes = [8, 32], strides = [1, 1]} : vector<8x128xf32> to vector<8x32xf32>
    %250 = vector.extract_strided_slice %246 {offsets = [0, 96], sizes = [8, 32], strides = [1, 1]} : vector<8x128xf32> to vector<8x32xf32>
    %251 = arith.mulf %248, %219 : vector<8x32xf32>
    %252 = arith.mulf %247, %249 : vector<8x32xf32>
    %253 = arith.addf %251, %252 : vector<8x32xf32>
    %254 = math.tanh %253 : vector<8x32xf32>
    %255 = arith.mulf %250, %254 : vector<8x32xf32>
    %256 = arith.truncf %255 : vector<8x32xf32> to vector<8x32xbf16>
    %cst_33 = arith.constant dense<0.000000e+00> : vector<8x128xf32>
    %257 = tpu.matmul %256, %5, %cst_33 {dimension_numbers = #tpu.dot_dimension_numbers<[1], [0], [0], [1], [0, 0, 1, 1], [], []>} : vector<8x32xbf16>, vector<32x128xbf16>, vector<8x128xf32> -> vector<8x128xf32>
    %cst_34 = arith.constant dense<0.000000e+00> : vector<8x128xf32>
    %258 = tpu.matmul %239, %7, %cst_34 {dimension_numbers = #tpu.dot_dimension_numbers<[1], [0], [0], [1], [0, 0, 1, 1], [], []>} : vector<8x32xbf16>, vector<32x128xbf16>, vector<8x128xf32> -> vector<8x128xf32>
    %259 = arith.addf %257, %258 : vector<8x128xf32>
    %260 = arith.addf %259, %13 : vector<8x128xf32>
    %261 = math.tanh %260 : vector<8x128xf32>
    %262 = arith.mulf %261, %30 : vector<8x128xf32>
    %263 = arith.addf %262, %33 : vector<8x128xf32>
    %264 = vector.extract_strided_slice %263 {offsets = [0, 0], sizes = [8, 32], strides = [1, 1]} : vector<8x128xf32> to vector<8x32xf32>
    %265 = vector.extract_strided_slice %263 {offsets = [0, 32], sizes = [8, 32], strides = [1, 1]} : vector<8x128xf32> to vector<8x32xf32>
    %266 = vector.extract_strided_slice %263 {offsets = [0, 64], sizes = [8, 32], strides = [1, 1]} : vector<8x128xf32> to vector<8x32xf32>
    %267 = vector.extract_strided_slice %263 {offsets = [0, 96], sizes = [8, 32], strides = [1, 1]} : vector<8x128xf32> to vector<8x32xf32>
    %268 = arith.mulf %265, %236 : vector<8x32xf32>
    %269 = arith.mulf %264, %266 : vector<8x32xf32>
    %270 = arith.addf %268, %269 : vector<8x32xf32>
    %271 = math.tanh %270 : vector<8x32xf32>
    %272 = arith.mulf %267, %271 : vector<8x32xf32>
    %273 = arith.truncf %272 : vector<8x32xf32> to vector<8x32xbf16>
    %274 = vector.extract_strided_slice %21 {offsets = [56, 0], sizes = [8, 128], strides = [1, 1]} : vector<64x128xf32> to vector<8x128xf32>
    %275 = arith.truncf %255 : vector<8x32xf32> to vector<8x32xbf16>
    %cst_35 = arith.constant dense<0.000000e+00> : vector<8x128xf32>
    %276 = tpu.matmul %275, %3, %cst_35 {dimension_numbers = #tpu.dot_dimension_numbers<[1], [0], [0], [1], [0, 0, 1, 1], [], []>} : vector<8x32xbf16>, vector<32x128xbf16>, vector<8x128xf32> -> vector<8x128xf32>
    %277 = arith.addf %274, %276 : vector<8x128xf32>
    %278 = math.tanh %277 : vector<8x128xf32>
    %279 = arith.mulf %278, %30 : vector<8x128xf32>
    %280 = arith.addf %279, %33 : vector<8x128xf32>
    %281 = vector.extract_strided_slice %280 {offsets = [0, 0], sizes = [8, 32], strides = [1, 1]} : vector<8x128xf32> to vector<8x32xf32>
    %282 = vector.extract_strided_slice %280 {offsets = [0, 32], sizes = [8, 32], strides = [1, 1]} : vector<8x128xf32> to vector<8x32xf32>
    %283 = vector.extract_strided_slice %280 {offsets = [0, 64], sizes = [8, 32], strides = [1, 1]} : vector<8x128xf32> to vector<8x32xf32>
    %284 = vector.extract_strided_slice %280 {offsets = [0, 96], sizes = [8, 32], strides = [1, 1]} : vector<8x128xf32> to vector<8x32xf32>
    %285 = arith.mulf %282, %253 : vector<8x32xf32>
    %286 = arith.mulf %281, %283 : vector<8x32xf32>
    %287 = arith.addf %285, %286 : vector<8x32xf32>
    %288 = math.tanh %287 : vector<8x32xf32>
    %289 = arith.mulf %284, %288 : vector<8x32xf32>
    %290 = arith.truncf %289 : vector<8x32xf32> to vector<8x32xbf16>
    %cst_36 = arith.constant dense<0.000000e+00> : vector<8x128xf32>
    %291 = tpu.matmul %290, %5, %cst_36 {dimension_numbers = #tpu.dot_dimension_numbers<[1], [0], [0], [1], [0, 0, 1, 1], [], []>} : vector<8x32xbf16>, vector<32x128xbf16>, vector<8x128xf32> -> vector<8x128xf32>
    %cst_37 = arith.constant dense<0.000000e+00> : vector<8x128xf32>
    %292 = tpu.matmul %273, %7, %cst_37 {dimension_numbers = #tpu.dot_dimension_numbers<[1], [0], [0], [1], [0, 0, 1, 1], [], []>} : vector<8x32xbf16>, vector<32x128xbf16>, vector<8x128xf32> -> vector<8x128xf32>
    %293 = arith.addf %291, %292 : vector<8x128xf32>
    %294 = arith.addf %293, %13 : vector<8x128xf32>
    %295 = math.tanh %294 : vector<8x128xf32>
    %296 = arith.mulf %295, %30 : vector<8x128xf32>
    %297 = arith.addf %296, %33 : vector<8x128xf32>
    %298 = vector.extract_strided_slice %297 {offsets = [0, 0], sizes = [8, 32], strides = [1, 1]} : vector<8x128xf32> to vector<8x32xf32>
    %299 = vector.extract_strided_slice %297 {offsets = [0, 32], sizes = [8, 32], strides = [1, 1]} : vector<8x128xf32> to vector<8x32xf32>
    %300 = vector.extract_strided_slice %297 {offsets = [0, 64], sizes = [8, 32], strides = [1, 1]} : vector<8x128xf32> to vector<8x32xf32>
    %301 = vector.extract_strided_slice %297 {offsets = [0, 96], sizes = [8, 32], strides = [1, 1]} : vector<8x128xf32> to vector<8x32xf32>
    %302 = arith.mulf %299, %270 : vector<8x32xf32>
    %303 = arith.mulf %298, %300 : vector<8x32xf32>
    %304 = arith.addf %302, %303 : vector<8x32xf32>
    %305 = math.tanh %304 : vector<8x32xf32>
    %306 = arith.mulf %301, %305 : vector<8x32xf32>
    %307 = arith.truncf %306 : vector<8x32xf32> to vector<8x32xbf16>
    %cst_38 = arith.constant dense<0.000000e+00> : vector<8x128xf32>
    %308 = tpu.matmul %307, %9, %cst_38 {dimension_numbers = #tpu.dot_dimension_numbers<[1], [0], [0], [1], [0, 0, 1, 1], [], []>} : vector<8x32xbf16>, vector<32x128xbf16>, vector<8x128xf32> -> vector<8x128xf32>
    %309 = arith.addf %308, %16 : vector<8x128xf32>
    %c0_39 = arith.constant 0 : index
    %c0_40 = arith.constant 0 : index
    %310 = vector.load %arg3[%c0_39, %c0_40] : memref<8x128xf32, #tpu.memory_space<vmem>>, vector<8x128xf32>
    tpu.vector_store %arg3[%c0_39, %c0_40], %309 {strides = array<i32>} : memref<8x128xf32, #tpu.memory_space<vmem>>, vector<8x128xf32>,
    return
  }
}

</mosaic_0001>

<bundles_post_ra>
// kernel: deeplog_forward.1
= control target key start
LH: loop header
LB: loop body
LE: loop exit
PB: predicated region body
PF: predicated region fallthrough
CT: control target
= control target key end

     0   :  { %8 = vsyncpa [#allocation3], 0  ;;  %s1069_s15 = smov [#allocation2]   ;;  %s1070_s17 = smov 128   ;;  %s1343_s0 = inlined_call_operand.vmem [shape: bf16[64,8], index: 0, kind: input, shape index: {}]   ;;  %s1344_s1 = inlined_call_operand.hbm [shape: f32[136,128], index: 1, kind: input, shape index: {}]   ;;  %s1345_s2 = inlined_call_operand.vmem [shape: f32[8,128], index: 2, kind: input, shape index: {}]   ;;  %s1346_s3 = inlined_call_operand.vmem [shape: f32[8,128], index: 3, kind: output, shape index: {}]  }
   0x1   :  { %s15_s14 = sshll.u32 %s1344_s1, 4  ;;  %s17_s16 = sshll.u32 %s1069_s15, 4  ;;  %s16_s14 = int_to_ptr.hbm [resolvable:$true] %s15_s14  ;;  %s18_s16 = int_to_ptr.vmem [resolvable:$true] %s17_s16 }
   0x2   :  { %s1071_s18 = smov 8  }
   0x3   :  { %23 = dma.hbm_to_vmem [thread:$0]  %s16_s14, 2176, %s18_s16, [#allocation3], %s1070_s17, %s1070_s17, %s1071_s18  }
   0x4   :  { %1067 = dma.done.wait [#allocation3], 2176  }
   0x5   :  { %1068 = vsyncadd [#allocation3], 4294965120  ;;  %v35_v0 = vld [vmem:[#allocation2 + $0x18] sm:$0xff]  ;;  %v36_v1 = vld [vmem:[#allocation2 + $0x20] sm:$0xff]  ;;  %vm102_vm0 = vcmask 1043456   ;;  %vm89_vm1 = vcmask 64512   ;;  %v135_v12 = vlaneseq }
   0x6   :  { %v31_v2 = vld [vmem:[#allocation2] sm:$0xff]  ;;  %v1099_v3 = vpack.c.bf16 %v36_v1, %v35_v0  ;;  %v33_v5 = vld [vmem:[#allocation2 + $0x8] sm:$0xff]  ;;  %v34_v6 = vld [vmem:[#allocation2 + $0x10] sm:$0xff]  ;;  %v1072_v10 = vmov 0   ;;  %v1073_v19 = vmov 0.5   ;;  %s1075_s22 = smov 32  }
   0x7   :  { %v32_v4 = vpack.c.bf16 %v31_v2, %v31_v2  ;;  %v968_v8 = vld [vmem:[%s1343_s0] sm:$0xff]  ;;  %v1105_v9 = vpack.c.bf16 %v34_v6, %v33_v5  ;;  %v136_v15 = vand.u32 127, %v135_v12  ;;  %v47_v32 = vld [vmem:[#allocation2 + $0x58] sm:$0xff]  ;;  %v45_v34 = vld [vmem:[#allocation2 + $0x48] sm:$0xff]  ;;  %vm142_vm5 = vcmask 261120  }
   0x8   :  { %152 = vmatpush.bf16.msra.mxu1 %v1099_v3  ;;  %v1118_v11 = vld [vmem:[%s1345_s2] sm:$0xff]  ;;  %s1074_s2 = smov 64   ;;  %v46_v36 = vld [vmem:[#allocation2 + $0x50] sm:$0xff]  ;;  %v41_v37 = vld [vmem:[#allocation2 + $0x38] sm:$0xff] }
   0x9   :  { %v104_v7 = vsel %vm102_vm0, %v32_v4, 0  ;;  %v1121_v13 = vperm.slane %v1118_v11, 0  ;;  %vm137_vm2 = vcmp.ge.s32.totalorder %v136_v15, 64  ;;  %vm138_vm3 = vcmp.lt.s32.totalorder %v136_v15, 96  ;;  %v48_v33 = vld [vmem:[#allocation2 + $0x60] sm:$0xff]  ;;  %v39_v40 = vld [vmem:[#allocation2 + $0x28] sm:$0xff] }
   0xa   :  { %113 = vmatpush.bf16.msra.mxu0 %v104_v7  ;;  %vm139_vm4 = vmand %vm137_vm2, %vm138_vm3  ;;  %v1136_v35 = vpack.c.bf16 %v48_v33, %v47_v32  ;;  %v42_v38 = vld [vmem:[#allocation2 + $0x40] sm:$0xff]  ;;  %v40_v41 = vld [vmem:[#allocation2 + $0x30] sm:$0xff]  ;;  %v1141_v42 = vpack.c.bf16 %v46_v36, %v45_v34  ;;  %v1164_v51 = vperm.slane %v1118_v11, 1 }
   0xb   :  { %v1124_v20 = vsel %vm139_vm4, 1.0, %v1073_v19  ;;  %v1126_v23 = vsel %vm139_vm4, 0.0, %v1073_v19  ;;  %v1138_v39 = vpack.c.bf16 %v42_v38, %v41_v37  ;;  %v1145_v43 = vpack.c.bf16 %v40_v41, %v39_v40 }
   0xc   :  { %153 = vmatpush.bf16.msra.mxu1 %v1105_v9  ;;  %187 = vmatpush.bf16.msra.mxu2 %v1136_v35 }
   0xd   :  { %941 = vmatmul.msk.bf16.vlgmr.msra.gmra.mxu0 %vm89_vm1, %v968_v8  ;;  %206 = vmatpush.bf16.msra.mxu3 %v1138_v39 }
   0xe   :  { %526 = vmatpush.bf16.msrb.mxu0 %v1099_v3 }
   0xf   :  { %154 = vmatmul.bf16.vlgmr.msra.gmra.mxu1 %v1072_v10 }
  0x10   :  { %241 = vmatpush.bf16.msrb.mxu1 %v1099_v3  ;;  %188 = vmatpush.bf16.msra.mxu2 %v1141_v42 }
  0x11   :  { %207 = vmatpush.bf16.msra.mxu3 %v1145_v43 }
  0x12   :  { %527 = vmatpush.bf16.msrb.mxu0 %v1105_v9 }
  0x13   :  { %189 = vmatmul.bf16.vlgmr.msra.gmra.mxu2 %v1072_v10 }
  0x14   :  { %242 = vmatpush.bf16.msrb.mxu1 %v1105_v9  ;;  %282 = vmatpush.bf16.msrb.mxu2 %v1136_v35 }
  0x15   :  { %301 = vmatpush.bf16.msrb.mxu3 %v1138_v39 }
  0x16   :  { %662 = vmatpush.bf16.msra.mxu0 %v1136_v35 }
  0x18   :  { %336 = vmatpush.bf16.msra.mxu1 %v1099_v3  ;;  %283 = vmatpush.bf16.msrb.mxu2 %v1141_v42 }
  0x19   :  { %302 = vmatpush.bf16.msrb.mxu3 %v1145_v43 }
  0x1a   :  { %663 = vmatpush.bf16.msra.mxu0 %v1141_v42 }
  0x1c   :  { %337 = vmatpush.bf16.msra.mxu1 %v1105_v9  ;;  %377 = vmatpush.bf16.msra.mxu2 %v1136_v35 }
  0x20   :  { %378 = vmatpush.bf16.msra.mxu2 %v1141_v42 }
  0x8a   :  { %v115_v14 = vpop.f32.mrf.mxu0 }
  0x8b   :  { %v116_v16 = vadd.f32 %v115_v14, %v1121_v13 }
  0x8c   :  { %v155_v17 = vpop.f32.mrf.mxu1 }
  0x8d   :  { %v159_v18 = vadd.f32 %v155_v17, %v116_v16 }
  0x8f   :  { %979 = vtanh.f32 %v159_v18 }
  0x92   :  { %v117_v52 = vpop.f32.mrf.mxu0 }
  0x93   :  { %v118_v56 = vadd.f32 %v117_v52, %v1121_v13 }
  0x94   :  { %v157_v21 = vpop.f32.mrf.mxu1 }
  0x95   :  { %v980_v22 = vpop.eup %979 }
  0x96   :  { %v161_v24 = vmul.f32 %v980_v22, %v1124_v20  ;;  %v190_v47 = vpop.f32.mrf.mxu2  ;;  %v969_v22 = vld [vmem:[%s1343_s0 + $0x8] sm:$0xff] }
  0x97   :  { %942 = vmatmul.msk.bf16.gmra.mxu0 %vm89_vm1, %v969_v22 }
  0x98   :  { %v162_v25 = vadd.f32 %v161_v24, %v1126_v23 }
  0x9a   :  { %165 = vrot.lane.b32.xlu0 %v162_v25, %s1074_s2  ;;  %v163_v28 = vmul.f32 0.0, %v162_v25 }
  0x9e   :  { %v192_v49 = vpop.f32.mrf.mxu2 }
 0x10c   :  { %v166_v26 = vpop.permute.xlu0 %165 }
 0x10d   :  { %v168_v27 = vmul.f32 %v166_v26, %v162_v25 }
 0x10f   :  { %170 = vrot.lane.b32.xlu0 %v168_v27, %s1075_s22 }
 0x181   :  { %v171_v29 = vpop.permute.xlu0 %170 }
 0x182   :  { %v1132_v30 = vadd.f32 %v171_v29, %v163_v28  ;;  %v120_v29 = vpop.f32.mrf.mxu0 }
 0x184   :  { %981 = vtanh.f32 %v1132_v30 }
 0x18a   :  { %v982_v31 = vpop.eup %981 }
 0x18b   :  { %176 = vrot.lane.b32.xlu1 %v982_v31, %s1074_s2 }
 0x1fd   :  { %v177_v44 = vpop.permute.xlu1 %176 }
 0x1fe   :  { %v179_v45 = vmul.f32 %v177_v44, %v162_v25 }
 0x200   :  { %v180_v46 = vpack.c.bf16 %v179_v45, %v179_v45 }
 0x202   :  { %195 = vrot.lane.b32.xlu1 %v180_v46, %s1075_s22 }
 0x274   :  { %v196_v48 = vpop.permute.xlu1 %195 }
 0x275   :  { %945 = vmatmul.msk.bf16.vlgmr.msra.gmra.mxu3 %vm142_vm5, %v196_v48  ;;  %946 = vmatmul.msk.bf16.vlgmr.msrb.gmra.mxu1 %vm142_vm5, %v196_v48 }
 0x276   :  { %431 = vmatpush.bf16.msrb.mxu1 %v1099_v3  ;;  %396 = vmatpush.bf16.msra.mxu3 %v1138_v39 }
 0x27a   :  { %432 = vmatpush.bf16.msrb.mxu1 %v1105_v9  ;;  %397 = vmatpush.bf16.msra.mxu3 %v1145_v43 }
 0x2f2   :  { %v244_v50 = vpop.f32.mrf.mxu1 }
 0x2f3   :  { %v248_v58 = vadd.f32 %v244_v50, %v118_v56 }
 0x2f8   :  { %v209_v53 = vpop.f32.mrf.mxu3 }
 0x2f9   :  { %v210_v54 = vadd.f32 %v209_v53, %v190_v47 }
 0x2fa   :  { %v246_v55 = vpop.f32.mrf.mxu1 }
 0x2fb   :  { %v213_v57 = vadd.f32 %v210_v54, %v1164_v51 }
 0x2fd   :  { %983 = vtanh.f32 %v213_v57 }
 0x2fe   :  { %985 = vtanh.f32 %v248_v58 }
 0x300   :  { %v211_v59 = vpop.f32.mrf.mxu3 }
 0x303   :  { %v984_v60 = vpop.eup %983 }
 0x304   :  { %v215_v61 = vmul.f32 %v984_v60, %v1124_v20  ;;  %v986_v63 = vpop.eup %985 }
 0x305   :  { %v250_v0 = vmul.f32 %v986_v63, %v1124_v20 }
 0x306   :  { %v216_v62 = vadd.f32 %v215_v61, %v1126_v23 }
 0x307   :  { %v251_v1 = vadd.f32 %v250_v0, %v1126_v23 }
 0x308   :  { %219 = vrot.lane.b32.xlu2 %v216_v62, %s1074_s2  ;;  %v217_v7 = vmul.f32 0.0, %v216_v62 }
 0x309   :  { %v252_v12 = vmul.f32 %v251_v1, %v1132_v30  ;;  %v121_v30 = vadd.f32 %v120_v29, %v1121_v13 }
 0x310   :  { %254 = vrot.lane.b32.xlu2 %v251_v1, %s1074_s2 }
 0x362   :  { %v220_v2 = vpop.permute.xlu2 %219 }
 0x363   :  { %v222_v4 = vmul.f32 %v220_v2, %v216_v62 }
 0x365   :  { %224 = vrot.lane.b32.xlu0 %v222_v4, %s1075_s22 }
 0x36a   :  { %v255_v5 = vpop.permute.xlu2 %254 }
 0x36b   :  { %v257_v6 = vmul.f32 %v255_v5, %v251_v1 }
 0x36d   :  { %259 = vrot.lane.b32.xlu1 %v257_v6, %s1075_s22 }
 0x3d7   :  { %v225_v8 = vpop.permute.xlu0 %224 }
 0x3d8   :  { %v227_v10 = vadd.f32 %v225_v8, %v217_v7  ;;  %v122_v8 = vpop.f32.mrf.mxu0 }
 0x3da   :  { %987 = vtanh.f32 %v227_v10 }
 0x3df   :  { %v260_v14 = vpop.permute.xlu1 %259 }
 0x3e0   :  { %v988_v15 = vpop.eup %987  ;;  %v262_v16 = vadd.f32 %v260_v14, %v252_v12 }
 0x3e1   :  { %230 = vrot.lane.b32.xlu2 %v988_v15, %s1074_s2 }
 0x3e2   :  { %989 = vtanh.f32 %v262_v16 }
 0x3e8   :  { %v990_v17 = vpop.eup %989 }
 0x3e9   :  { %265 = vrot.lane.b32.xlu0 %v990_v17, %s1074_s2 }
 0x43b   :  { %v231_v18 = vpop.permute.xlu2 %230 }
 0x43c   :  { %v233_v19 = vmul.f32 %v231_v18, %v216_v62 }
 0x43e   :  { %v234_v21 = vpack.c.bf16 %v233_v19, %v233_v19 }
 0x440   :  { %271 = vrot.lane.b32.xlu1 %v234_v21, %s1075_s22 }
 0x45b   :  { %v266_v24 = vpop.permute.xlu0 %265 }
 0x45c   :  { %v268_v25 = vmul.f32 %v266_v24, %v251_v1 }
 0x45e   :  { %v269_v26 = vpack.c.bf16 %v268_v25, %v268_v25 }
 0x460   :  { %290 = vrot.lane.b32.xlu2 %v269_v26, %s1075_s22 }
 0x4b2   :  { %v272_v27 = vpop.permute.xlu1 %271 }
 0x4b3   :  { %947 = vmatmul.msk.bf16.vlgmr.msrb.gmra.mxu2 %vm142_vm5, %v272_v27 }
 0x4b4   :  { %472 = vmatpush.bf16.msrb.mxu2 %v1136_v35 }
 0x4b8   :  { %473 = vmatpush.bf16.msrb.mxu2 %v1141_v42 }
 0x4ba   :  { %v291_v28 = vpop.permute.xlu2 %290 }
 0x4bb   :  { %948 = vmatmul.msk.bf16.vlgmr.msrb.gmra.mxu3 %vm142_vm5, %v291_v28  ;;  %949 = vmatmul.msk.bf16.vlgmr.msra.gmra.mxu1 %vm142_vm5, %v291_v28 }
 0x4bc   :  { %491 = vmatpush.bf16.msrb.mxu3 %v1138_v39  ;;  %567 = vmatpush.bf16.msra.mxu1 %v1136_v35 }
 0x4c0   :  { %492 = vmatpush.bf16.msrb.mxu3 %v1145_v43  ;;  %568 = vmatpush.bf16.msra.mxu1 %v1141_v42 }
 0x536   :  { %v285_v31 = vpop.f32.mrf.mxu2 }
 0x538   :  { %v339_v32 = vpop.f32.mrf.mxu1 }
 0x539   :  { %v343_v33 = vadd.f32 %v339_v32, %v121_v30 }
 0x53b   :  { %991 = vtanh.f32 %v343_v33 }
 0x53e   :  { %v287_v34 = vpop.f32.mrf.mxu2  ;;  %v304_v36 = vpop.f32.mrf.mxu3 }
 0x53f   :  { %v305_v37 = vadd.f32 %v304_v36, %v285_v31 }
 0x540   :  { %v341_v38 = vpop.f32.mrf.mxu1 }
 0x541   :  { %v992_v40 = vpop.eup %991  ;;  %v308_v41 = vadd.f32 %v305_v37, %v1164_v51 }
 0x542   :  { %v345_v44 = vmul.f32 %v992_v40, %v1124_v20 }
 0x543   :  { %993 = vtanh.f32 %v308_v41 }
 0x544   :  { %v346_v45 = vadd.f32 %v345_v44, %v1126_v23 }
 0x546   :  { %349 = vrot.lane.b32.xlu1 %v346_v45, %s1074_s2  ;;  %v306_v46 = vpop.f32.mrf.mxu3  ;;  %v347_v59 = vmul.f32 %v346_v45, %v262_v16 }
 0x547   :  { %v970_v46 = vld [vmem:[%s1343_s0 + $0x10] sm:$0xff] }
 0x548   :  { %943 = vmatmul.msk.bf16.gmra.mxu0 %vm89_vm1, %v970_v46 }
 0x549   :  { %v994_v47 = vpop.eup %993 }
 0x54a   :  { %v310_v48 = vmul.f32 %v994_v47, %v1124_v20 }
 0x54c   :  { %v311_v49 = vadd.f32 %v310_v48, %v1126_v23 }
 0x54e   :  { %314 = vrot.lane.b32.xlu0 %v311_v49, %s1074_s2  ;;  %v312_v55 = vmul.f32 %v311_v49, %v227_v10  ;;  %v123_v10 = vadd.f32 %v122_v8, %v1121_v13 }
 0x5b8   :  { %v350_v50 = vpop.permute.xlu1 %349 }
 0x5b9   :  { %v352_v52 = vmul.f32 %v350_v50, %v346_v45  ;;  %v971_v50 = vld [vmem:[%s1343_s0 + $0x18] sm:$0xff] }
 0x5ba   :  { %944 = vmatmul.msk.bf16.gmra.mxu0 %vm89_vm1, %v971_v50 }
 0x5bb   :  { %354 = vrot.lane.b32.xlu0 %v352_v52, %s1075_s22 }
 0x5c0   :  { %v315_v53 = vpop.permute.xlu0 %314 }
 0x5c1   :  { %v317_v54 = vmul.f32 %v315_v53, %v311_v49 }
 0x5c3   :  { %319 = vrot.lane.b32.xlu2 %v317_v54, %s1075_s22 }
 0x61d   :  { %v320_v56 = vpop.permute.xlu2 %319 }
 0x61e   :  { %v322_v57 = vadd.f32 %v320_v56, %v312_v55 }
 0x620   :  { %995 = vtanh.f32 %v322_v57 }
 0x626   :  { %v996_v58 = vpop.eup %995 }
 0x627   :  { %325 = vrot.lane.b32.xlu1 %v996_v58, %s1074_s2 }
 0x62d   :  { %v355_v60 = vpop.permute.xlu0 %354 }
 0x62e   :  { %v357_v61 = vadd.f32 %v355_v60, %v347_v59 }
 0x630   :  { %997 = vtanh.f32 %v357_v61 }
 0x636   :  { %v998_v62 = vpop.eup %997 }
 0x637   :  { %360 = vrot.lane.b32.xlu2 %v998_v62, %s1074_s2 }
 0x691   :  { %v361_v63 = vpop.permute.xlu2 %360 }
 0x692   :  { %v363_v0 = vmul.f32 %v361_v63, %v346_v45 }
 0x694   :  { %v364_v1 = vpack.c.bf16 %v363_v0, %v363_v0 }
 0x696   :  { %385 = vrot.lane.b32.xlu1 %v364_v1, %s1075_s22 }
 0x699   :  { %v326_v2 = vpop.permute.xlu1 %325 }
 0x69a   :  { %v328_v4 = vmul.f32 %v326_v2, %v311_v49 }
 0x69c   :  { %v329_v5 = vpack.c.bf16 %v328_v4, %v328_v4 }
 0x69e   :  { %366 = vrot.lane.b32.xlu0 %v329_v5, %s1075_s22 }
 0x708   :  { %v386_v6 = vpop.permute.xlu1 %385 }
 0x709   :  { %951 = vmatmul.msk.bf16.vlgmr.msra.gmra.mxu3 %vm142_vm5, %v386_v6  ;;  %952 = vmatmul.msk.bf16.vlgmr.msrb.gmra.mxu1 %vm142_vm5, %v386_v6 }
 0x70a   :  { %621 = vmatpush.bf16.msra.mxu3 %v1099_v3  ;;  %681 = vmatpush.bf16.msrb.mxu1 %v1138_v39 }
 0x70e   :  { %622 = vmatpush.bf16.msra.mxu3 %v1105_v9  ;;  %682 = vmatpush.bf16.msrb.mxu1 %v1145_v43 }
 0x710   :  { %v367_v7 = vpop.permute.xlu0 %366 }
 0x711   :  { %950 = vmatmul.msk.bf16.vlgmr.msra.gmra.mxu2 %vm142_vm5, %v367_v7 }
 0x712   :  { %586 = vmatpush.bf16.msra.mxu2 %v1138_v39 }
 0x716   :  { %587 = vmatpush.bf16.msra.mxu2 %v1145_v43 }
 0x786   :  { %v434_v12 = vpop.f32.mrf.mxu1 }
 0x787   :  { %v438_v14 = vadd.f32 %v434_v12, %v123_v10 }
 0x789   :  { %999 = vtanh.f32 %v438_v14 }
 0x78c   :  { %v399_v15 = vpop.f32.mrf.mxu3 }
 0x78e   :  { %v436_v16 = vpop.f32.mrf.mxu1 }
 0x78f   :  { %v1000_v17 = vpop.eup %999 }
 0x790   :  { %v440_v18 = vmul.f32 %v1000_v17, %v1124_v20 }
 0x792   :  { %v441_v19 = vadd.f32 %v440_v18, %v1126_v23 }
 0x794   :  { %v380_v21 = vpop.f32.mrf.mxu2  ;;  %444 = vrot.lane.b32.xlu0 %v441_v19, %s1074_s2  ;;  %v401_v22 = vpop.f32.mrf.mxu3  ;;  %v442_v34 = vmul.f32 %v441_v19, %v357_v61 }
 0x795   :  { %v400_v24 = vadd.f32 %v399_v15, %v380_v21 }
 0x797   :  { %v403_v25 = vadd.f32 %v400_v24, %v1164_v51 }
 0x799   :  { %1001 = vtanh.f32 %v403_v25 }
 0x79c   :  { %v382_v26 = vpop.f32.mrf.mxu2 }
 0x79f   :  { %v1002_v27 = vpop.eup %1001 }
 0x7a0   :  { %v405_v28 = vmul.f32 %v1002_v27, %v1124_v20 }
 0x7a2   :  { %v406_v29 = vadd.f32 %v405_v28, %v1126_v23 }
 0x7a4   :  { %409 = vrot.lane.b32.xlu2 %v406_v29, %s1074_s2  ;;  %v407_v40 = vmul.f32 %v406_v29, %v322_v57  ;;  %v125_v57 = vpop.f32.mrf.mxu0 }
 0x7a5   :  { %v126_v62 = vadd.f32 %v125_v57, %v1121_v13 }
 0x7ac   :  { %v127_v58 = vpop.f32.mrf.mxu0 }
 0x7b4   :  { %v1251_v59 = vpop.f32.mrf.mxu0 }
 0x7bc   :  { %v1253_v60 = vpop.f32.mrf.mxu0 }
 0x7fe   :  { %v410_v30 = vpop.permute.xlu2 %409 }
 0x7ff   :  { %v412_v31 = vmul.f32 %v410_v30, %v406_v29 }
 0x801   :  { %414 = vrot.lane.b32.xlu1 %v412_v31, %s1075_s22 }
 0x806   :  { %v445_v32 = vpop.permute.xlu0 %444 }
 0x807   :  { %v447_v33 = vmul.f32 %v445_v32, %v441_v19 }
 0x809   :  { %449 = vrot.lane.b32.xlu2 %v447_v33, %s1075_s22 }
 0x863   :  { %v450_v36 = vpop.permute.xlu2 %449 }
 0x864   :  { %v1227_v37 = vadd.f32 %v450_v36, %v442_v34 }
 0x866   :  { %1003 = vtanh.f32 %v1227_v37 }
 0x86c   :  { %v1004_v38 = vpop.eup %1003 }
 0x86d   :  { %455 = vrot.lane.b32.xlu1 %v1004_v38, %s1074_s2 }
 0x873   :  { %v415_v41 = vpop.permute.xlu1 %414 }
 0x874   :  { %v417_v44 = vadd.f32 %v415_v41, %v407_v40 }
 0x876   :  { %1005 = vtanh.f32 %v417_v44 }
 0x87c   :  { %v1006_v45 = vpop.eup %1005 }
 0x87d   :  { %420 = vrot.lane.b32.xlu0 %v1006_v45, %s1074_s2  ;;  %v128_v45 = vadd.f32 %v127_v58, %v1121_v13 }
 0x8df   :  { %v456_v47 = vpop.permute.xlu1 %455 }
 0x8e0   :  { %v458_v48 = vmul.f32 %v456_v47, %v441_v19 }
 0x8e2   :  { %v459_v49 = vpack.c.bf16 %v458_v48, %v458_v48 }
 0x8e4   :  { %480 = vrot.lane.b32.xlu0 %v459_v49, %s1075_s22 }
 0x8ef   :  { %v421_v52 = vpop.permute.xlu0 %420 }
 0x8f0   :  { %v423_v53 = vmul.f32 %v421_v52, %v406_v29 }
 0x8f2   :  { %v424_v54 = vpack.c.bf16 %v423_v53, %v423_v53 }
 0x8f4   :  { %461 = vrot.lane.b32.xlu2 %v424_v54, %s1075_s22 }
 0x94e   :  { %v462_v55 = vpop.permute.xlu2 %461 }
 0x94f   :  { %953 = vmatmul.msk.bf16.vlgmr.msrb.gmra.mxu2 %vm142_vm5, %v462_v55 }
 0x950   :  { %716 = vmatpush.bf16.msrb.mxu2 %v1099_v3 }
 0x954   :  { %717 = vmatpush.bf16.msrb.mxu2 %v1105_v9 }
 0x956   :  { %v481_v56 = vpop.permute.xlu0 %480 }
 0x957   :  { %954 = vmatmul.msk.bf16.vlgmr.msrb.gmra.mxu3 %vm142_vm5, %v481_v56  ;;  %955 = vmatmul.msk.bf16.vlgmr.msrb.gmra.mxu0 %vm142_vm5, %v481_v56 }
 0x958   :  { %757 = vmatpush.bf16.msrb.mxu3 %v1136_v35  ;;  %776 = vmatpush.bf16.msrb.mxu0 %v1138_v39 }
 0x95c   :  { %758 = vmatpush.bf16.msrb.mxu3 %v1141_v42  ;;  %777 = vmatpush.bf16.msrb.mxu0 %v1145_v43 }
 0x9d2   :  { %v475_v61 = vpop.f32.mrf.mxu2 }
 0x9d4   :  { %v529_v63 = vpop.f32.mrf.mxu0 }
 0x9d5   :  { %v533_v0 = vadd.f32 %v529_v63, %v126_v62 }
 0x9d7   :  { %1007 = vtanh.f32 %v533_v0 }
 0x9da   :  { %v477_v1 = vpop.f32.mrf.mxu2  ;;  %v494_v2 = vpop.f32.mrf.mxu3 }
 0x9db   :  { %v495_v4 = vadd.f32 %v494_v2, %v475_v61 }
 0x9dc   :  { %v531_v5 = vpop.f32.mrf.mxu0 }
 0x9dd   :  { %v1008_v6 = vpop.eup %1007  ;;  %v498_v7 = vadd.f32 %v495_v4, %v1164_v51 }
 0x9de   :  { %v535_v8 = vmul.f32 %v1008_v6, %v1124_v20 }
 0x9df   :  { %1009 = vtanh.f32 %v498_v7 }
 0x9e0   :  { %v536_v10 = vadd.f32 %v535_v8, %v1126_v23 }
 0x9e2   :  { %539 = vrot.lane.b32.xlu1 %v536_v10, %s1074_s2  ;;  %v496_v12 = vpop.f32.mrf.mxu3  ;;  %v537_v27 = vmul.f32 %v536_v10, %v1227_v37 }
 0x9e5   :  { %v1010_v14 = vpop.eup %1009 }
 0x9e6   :  { %v500_v15 = vmul.f32 %v1010_v14, %v1124_v20 }
 0x9e8   :  { %v501_v16 = vadd.f32 %v500_v15, %v1126_v23 }
 0x9ea   :  { %504 = vrot.lane.b32.xlu2 %v501_v16, %s1074_s2  ;;  %v502_v22 = vmul.f32 %v501_v16, %v417_v44 }
 0xa44   :  { %v505_v17 = vpop.permute.xlu2 %504 }
 0xa45   :  { %v507_v18 = vmul.f32 %v505_v17, %v501_v16 }
 0xa47   :  { %509 = vrot.lane.b32.xlu1 %v507_v18, %s1075_s22 }
 0xa54   :  { %v540_v19 = vpop.permute.xlu1 %539 }
 0xa55   :  { %v542_v21 = vmul.f32 %v540_v19, %v536_v10  ;;  %v131_v19 = vadd.f32 %v1251_v59, %v1121_v13 }
 0xa57   :  { %544 = vrot.lane.b32.xlu0 %v542_v21, %s1075_s22 }
 0xab9   :  { %v510_v24 = vpop.permute.xlu1 %509 }
 0xaba   :  { %v512_v25 = vadd.f32 %v510_v24, %v502_v22 }
 0xabc   :  { %1011 = vtanh.f32 %v512_v25 }
 0xac2   :  { %v1012_v26 = vpop.eup %1011 }
 0xac3   :  { %515 = vrot.lane.b32.xlu0 %v1012_v26, %s1074_s2 }
 0xac9   :  { %v545_v28 = vpop.permute.xlu0 %544 }
 0xaca   :  { %v547_v29 = vadd.f32 %v545_v28, %v537_v27 }
 0xacc   :  { %1013 = vtanh.f32 %v547_v29 }
 0xad2   :  { %v1014_v30 = vpop.eup %1013 }
 0xad3   :  { %550 = vrot.lane.b32.xlu2 %v1014_v30, %s1074_s2 }
 0xb2d   :  { %v551_v31 = vpop.permute.xlu2 %550 }
 0xb2e   :  { %v553_v32 = vmul.f32 %v551_v31, %v536_v10 }
 0xb30   :  { %v554_v33 = vpack.c.bf16 %v553_v32, %v553_v32 }
 0xb32   :  { %575 = vrot.lane.b32.xlu1 %v554_v33, %s1075_s22 }
 0xb35   :  { %v516_v34 = vpop.permute.xlu0 %515 }
 0xb36   :  { %v518_v36 = vmul.f32 %v516_v34, %v501_v16 }
 0xb38   :  { %v519_v38 = vpack.c.bf16 %v518_v36, %v518_v36 }
 0xb3a   :  { %556 = vrot.lane.b32.xlu2 %v519_v38, %s1075_s22 }
 0xb94   :  { %v557_v40 = vpop.permute.xlu2 %556 }
 0xb95   :  { %956 = vmatmul.msk.bf16.vlgmr.msra.gmra.mxu1 %vm142_vm5, %v557_v40 }
 0xb96   :  { %811 = vmatpush.bf16.msra.mxu1 %v1099_v3 }
 0xb9a   :  { %812 = vmatpush.bf16.msra.mxu1 %v1105_v9 }
 0xba4   :  { %v576_v37 = vpop.permute.xlu1 %575 }
 0xba5   :  { %957 = vmatmul.msk.bf16.vlgmr.msra.gmra.mxu2 %vm142_vm5, %v576_v37  ;;  %958 = vmatmul.msk.bf16.vlgmr.msra.gmra.mxu3 %vm142_vm5, %v576_v37 }
 0xba6   :  { %871 = vmatpush.bf16.msra.mxu3 %v1138_v39  ;;  %852 = vmatpush.bf16.msra.mxu2 %v1136_v35 }
 0xbaa   :  { %872 = vmatpush.bf16.msra.mxu3 %v1145_v43  ;;  %853 = vmatpush.bf16.msra.mxu2 %v1141_v42 }
 0xc12   :  { %v570_v41 = vpop.f32.mrf.mxu1 }
 0xc1a   :  { %v572_v44 = vpop.f32.mrf.mxu1 }
 0xc28   :  { %v589_v3 = vpop.f32.mrf.mxu2  ;;  %v624_v46 = vpop.f32.mrf.mxu3 }
 0xc29   :  { %v590_v9 = vadd.f32 %v589_v3, %v570_v41  ;;  %v628_v47 = vadd.f32 %v624_v46, %v128_v45 }
 0xc2b   :  { %v593_v48 = vadd.f32 %v590_v9, %v1164_v51  ;;  %1015 = vtanh.f32 %v628_v47 }
 0xc2d   :  { %1017 = vtanh.f32 %v593_v48 }
 0xc30   :  { %v591_v49 = vpop.f32.mrf.mxu2  ;;  %v626_v39 = vpop.f32.mrf.mxu3 }
 0xc31   :  { %v1016_v50 = vpop.eup %1015 }
 0xc32   :  { %v630_v35 = vmul.f32 %v1016_v50, %v1124_v20 }
 0xc33   :  { %v1018_v43 = vpop.eup %1017 }
 0xc34   :  { %v631_v42 = vadd.f32 %v630_v35, %v1126_v23  ;;  %v595_v52 = vmul.f32 %v1018_v43, %v1124_v20 }
 0xc36   :  { %634 = vrot.lane.b32.xlu1 %v631_v42, %s1074_s2  ;;  %v596_v53 = vadd.f32 %v595_v52, %v1126_v23  ;;  %v632_v0 = vmul.f32 %v631_v42, %v547_v29 }
 0xc38   :  { %599 = vrot.lane.b32.xlu0 %v596_v53, %s1074_s2  ;;  %v597_v58 = vmul.f32 %v596_v53, %v512_v25 }
 0xca8   :  { %v635_v54 = vpop.permute.xlu1 %634 }
 0xca9   :  { %v637_v55 = vmul.f32 %v635_v54, %v631_v42  ;;  %v133_v54 = vadd.f32 %v1253_v60, %v1121_v13 }
 0xcaa   :  { %v600_v56 = vpop.permute.xlu0 %599 }
 0xcab   :  { %v602_v57 = vmul.f32 %v600_v56, %v596_v53  ;;  %639 = vrot.lane.b32.xlu0 %v637_v55, %s1075_s22 }
 0xcad   :  { %604 = vrot.lane.b32.xlu2 %v602_v57, %s1075_s22 }
 0xd07   :  { %v605_v61 = vpop.permute.xlu2 %604 }
 0xd08   :  { %v607_v62 = vadd.f32 %v605_v61, %v597_v58 }
 0xd0a   :  { %1019 = vtanh.f32 %v607_v62 }
 0xd10   :  { %v1020_v63 = vpop.eup %1019 }
 0xd11   :  { %610 = vrot.lane.b32.xlu1 %v1020_v63, %s1074_s2 }
 0xd1d   :  { %v640_v1 = vpop.permute.xlu0 %639 }
 0xd1e   :  { %v642_v2 = vadd.f32 %v640_v1, %v632_v0 }
 0xd20   :  { %1021 = vtanh.f32 %v642_v2 }
 0xd26   :  { %v1022_v4 = vpop.eup %1021 }
 0xd27   :  { %645 = vrot.lane.b32.xlu2 %v1022_v4, %s1074_s2 }
 0xd81   :  { %v646_v5 = vpop.permute.xlu2 %645 }
 0xd82   :  { %v648_v6 = vmul.f32 %v646_v5, %v631_v42 }
 0xd83   :  { %v611_v7 = vpop.permute.xlu1 %610 }
 0xd84   :  { %v649_v8 = vpack.c.bf16 %v648_v6, %v648_v6  ;;  %v613_v10 = vmul.f32 %v611_v7, %v596_v53 }
 0xd86   :  { %v614_v12 = vpack.c.bf16 %v613_v10, %v613_v10  ;;  %670 = vrot.lane.b32.xlu1 %v649_v8, %s1075_s22 }
 0xd88   :  { %651 = vrot.lane.b32.xlu0 %v614_v12, %s1075_s22 }
 0xdf8   :  { %v671_v14 = vpop.permute.xlu1 %670 }
 0xdf9   :  { %960 = vmatmul.msk.bf16.vlgmr.msrb.gmra.mxu1 %vm142_vm5, %v671_v14  ;;  %961 = vmatmul.msk.bf16.vlgmr.msrb.gmra.mxu2 %vm142_vm5, %v671_v14 }
 0xdfa   :  { %v652_v15 = vpop.permute.xlu0 %651 }
 0xdfb   :  { %959 = vmatmul.msk.bf16.vlgmr.msra.gmra.mxu0 %vm142_vm5, %v652_v15 }
 0xe76   :  { %v684_v16 = vpop.f32.mrf.mxu1 }
 0xe78   :  { %v665_v17 = vpop.f32.mrf.mxu0 }
 0xe79   :  { %v685_v18 = vadd.f32 %v684_v16, %v665_v17 }
 0xe7b   :  { %v688_v21 = vadd.f32 %v685_v18, %v1164_v51 }
 0xe7c   :  { %v719_v22 = vpop.f32.mrf.mxu2 }
 0xe7d   :  { %1023 = vtanh.f32 %v688_v21  ;;  %v723_v24 = vadd.f32 %v719_v22, %v131_v19 }
 0xe7e   :  { %v686_v25 = vpop.f32.mrf.mxu1 }
 0xe7f   :  { %1025 = vtanh.f32 %v723_v24 }
 0xe80   :  { %v667_v26 = vpop.f32.mrf.mxu0 }
 0xe83   :  { %v1024_v27 = vpop.eup %1023 }
 0xe84   :  { %v721_v28 = vpop.f32.mrf.mxu2  ;;  %v690_v29 = vmul.f32 %v1024_v27, %v1124_v20 }
 0xe85   :  { %v1026_v30 = vpop.eup %1025 }
 0xe86   :  { %v725_v31 = vmul.f32 %v1026_v30, %v1124_v20  ;;  %v691_v32 = vadd.f32 %v690_v29, %v1126_v23 }
 0xe88   :  { %694 = vrot.lane.b32.xlu2 %v691_v32, %s1074_s2  ;;  %v726_v59 = vadd.f32 %v725_v31, %v1126_v23  ;;  %v692_v40 = vmul.f32 %v691_v32, %v607_v62 }
 0xe8a   :  { %729 = vrot.lane.b32.xlu0 %v726_v59, %s1074_s2  ;;  %v727_v44 = vmul.f32 %v726_v59, %v642_v2 }
 0xee2   :  { %v695_v33 = vpop.permute.xlu2 %694 }
 0xee3   :  { %v697_v34 = vmul.f32 %v695_v33, %v691_v32 }
 0xee5   :  { %699 = vrot.lane.b32.xlu1 %v697_v34, %s1075_s22 }
 0xefc   :  { %v730_v36 = vpop.permute.xlu0 %729 }
 0xefd   :  { %v732_v38 = vmul.f32 %v730_v36, %v726_v59 }
 0xeff   :  { %734 = vrot.lane.b32.xlu2 %v732_v38, %s1075_s22 }
 0xf57   :  { %v700_v37 = vpop.permute.xlu1 %699 }
 0xf58   :  { %v702_v41 = vadd.f32 %v700_v37, %v692_v40 }
 0xf59   :  { %v735_v45 = vpop.permute.xlu2 %734 }
 0xf5a   :  { %1027 = vtanh.f32 %v702_v41  ;;  %v737_v3 = vadd.f32 %v735_v45, %v727_v44 }
 0xf5c   :  { %1029 = vtanh.f32 %v737_v3 }
 0xf60   :  { %v1028_v46 = vpop.eup %1027 }
 0xf61   :  { %705 = vrot.lane.b32.xlu0 %v1028_v46, %s1074_s2 }
 0xf62   :  { %v1030_v9 = vpop.eup %1029 }
 0xf63   :  { %740 = vrot.lane.b32.xlu1 %v1030_v9, %s1074_s2  ;;  %v54_v9 = vld [vmem:[#allocation2 + $0x80] sm:$0xff] }
 0xfd3   :  { %v706_v47 = vpop.permute.xlu0 %705 }
 0xfd4   :  { %v708_v48 = vmul.f32 %v706_v47, %v691_v32  ;;  %v51_v47 = vld [vmem:[#allocation2 + $0x68] sm:$0xff] }
 0xfd5   :  { %v741_v49 = vpop.permute.xlu1 %740 }
 0xfd6   :  { %v709_v39 = vpack.c.bf16 %v708_v48, %v708_v48  ;;  %v743_v50 = vmul.f32 %v741_v49, %v726_v59 }
 0xfd8   :  { %v744_v35 = vpack.c.bf16 %v743_v50, %v743_v50  ;;  %746 = vrot.lane.b32.xlu2 %v709_v39, %s1075_s22 }
 0xfda   :  { %765 = vrot.lane.b32.xlu0 %v744_v35, %s1075_s22 }
0x1032   :  { %v747_v43 = vpop.permute.xlu2 %746 }
0x1033   :  { %962 = vmatmul.msk.bf16.vlgmr.msrb.gmra.mxu3 %vm142_vm5, %v747_v43  ;;  %v59_v43 = vperm.slane %v1118_v11, 2 }
0x104c   :  { %v766_v42 = vpop.permute.xlu0 %765 }
0x104d   :  { %963 = vmatmul.msk.bf16.vlgmr.msrb.gmra.mxu0 %vm142_vm5, %v766_v42  ;;  %964 = vmatmul.msk.bf16.vlgmr.msra.gmra.mxu1 %vm142_vm5, %v766_v42 }
0x10b6   :  { %v760_v52 = vpop.f32.mrf.mxu3 }
0x10be   :  { %v762_v53 = vpop.f32.mrf.mxu3 }
0x10ca   :  { %v779_v55 = vpop.f32.mrf.mxu0  ;;  %v814_v56 = vpop.f32.mrf.mxu1 }
0x10cb   :  { %v780_v57 = vadd.f32 %v779_v55, %v760_v52  ;;  %v818_v58 = vadd.f32 %v814_v56, %v133_v54 }
0x10cd   :  { %v783_v61 = vadd.f32 %v780_v57, %v1164_v51  ;;  %1031 = vtanh.f32 %v818_v58 }
0x10cf   :  { %1033 = vtanh.f32 %v783_v61 }
0x10d2   :  { %v781_v62 = vpop.f32.mrf.mxu0  ;;  %v816_v63 = vpop.f32.mrf.mxu1 }
0x10d3   :  { %v1032_v0 = vpop.eup %1031 }
0x10d4   :  { %v820_v1 = vmul.f32 %v1032_v0, %v1124_v20 }
0x10d5   :  { %v1034_v2 = vpop.eup %1033 }
0x10d6   :  { %v821_v4 = vadd.f32 %v820_v1, %v1126_v23  ;;  %v785_v5 = vmul.f32 %v1034_v2, %v1124_v20 }
0x10d8   :  { %824 = vrot.lane.b32.xlu2 %v821_v4, %s1074_s2  ;;  %v786_v13 = vadd.f32 %v785_v5, %v1126_v23  ;;  %v822_v10 = vmul.f32 %v821_v4, %v737_v3 }
0x10da   :  { %789 = vrot.lane.b32.xlu1 %v786_v13, %s1074_s2  ;;  %v787_v16 = vmul.f32 %v786_v13, %v702_v41 }
0x1132   :  { %v825_v60 = vpop.permute.xlu2 %824 }
0x1133   :  { %v827_v6 = vmul.f32 %v825_v60, %v821_v4 }
0x1135   :  { %829 = vrot.lane.b32.xlu1 %v827_v6, %s1075_s22 }
0x114c   :  { %v790_v7 = vpop.permute.xlu1 %789 }
0x114d   :  { %v792_v8 = vmul.f32 %v790_v7, %v786_v13 }
0x114f   :  { %794 = vrot.lane.b32.xlu0 %v792_v8, %s1075_s22 }
0x11a7   :  { %v830_v12 = vpop.permute.xlu1 %829 }
0x11a8   :  { %v832_v14 = vadd.f32 %v830_v12, %v822_v10 }
0x11aa   :  { %1035 = vtanh.f32 %v832_v14 }
0x11b0   :  { %v1036_v15 = vpop.eup %1035 }
0x11b1   :  { %835 = vrot.lane.b32.xlu0 %v1036_v15, %s1074_s2 }
0x11c1   :  { %v795_v17 = vpop.permute.xlu0 %794 }
0x11c2   :  { %v797_v18 = vadd.f32 %v795_v17, %v787_v16 }
0x11c4   :  { %1037 = vtanh.f32 %v797_v18 }
0x11ca   :  { %v1038_v19 = vpop.eup %1037 }
0x11cb   :  { %800 = vrot.lane.b32.xlu2 %v1038_v19, %s1074_s2 }
0x1223   :  { %v836_v21 = vpop.permute.xlu0 %835 }
0x1224   :  { %v838_v22 = vmul.f32 %v836_v21, %v821_v4 }
0x1225   :  { %v801_v24 = vpop.permute.xlu2 %800 }
0x1226   :  { %v839_v25 = vpack.c.bf16 %v838_v22, %v838_v22  ;;  %v803_v26 = vmul.f32 %v801_v24, %v786_v13 }
0x1228   :  { %v804_v27 = vpack.c.bf16 %v803_v26, %v803_v26  ;;  %860 = vrot.lane.b32.xlu2 %v839_v25, %s1075_s22 }
0x122a   :  { %841 = vrot.lane.b32.xlu1 %v804_v27, %s1075_s22 }
0x1282   :  { %v861_v28 = vpop.permute.xlu2 %860 }
0x1283   :  { %966 = vmatmul.msk.bf16.vlgmr.msra.gmra.mxu3 %vm142_vm5, %v861_v28 }
0x129c   :  { %v842_v29 = vpop.permute.xlu1 %841 }
0x129d   :  { %965 = vmatmul.msk.bf16.vlgmr.msra.gmra.mxu2 %vm142_vm5, %v842_v29 }
0x1306   :  { %v874_v30 = vpop.f32.mrf.mxu3 }
0x130e   :  { %v876_v31 = vpop.f32.mrf.mxu3 }
0x1320   :  { %v855_v32 = vpop.f32.mrf.mxu2 }
0x1321   :  { %v875_v59 = vadd.f32 %v874_v30, %v855_v32 }
0x1323   :  { %v878_v33 = vadd.f32 %v875_v59, %v1164_v51  ;;  %v53_v51 = vld [vmem:[#allocation2 + $0x78] sm:$0xff] }
0x1324   :  { %v56_v48 = vpack.c.bf16 %v54_v9, %v53_v51 }
0x1325   :  { %1039 = vtanh.f32 %v878_v33 }
0x1326   :  { %912 = vmatpush.bf16.msra.mxu0 %v56_v48 }
0x1328   :  { %v857_v34 = vpop.f32.mrf.mxu2 }
0x132b   :  { %v1040_v36 = vpop.eup %1039 }
0x132c   :  { %v880_v38 = vmul.f32 %v1040_v36, %v1124_v20  ;;  %v52_v20 = vld [vmem:[#allocation2 + $0x70] sm:$0xff] }
0x132e   :  { %v881_v40 = vadd.f32 %v880_v38, %v1126_v23  ;;  %v55_v23 = vpack.c.bf16 %v52_v20, %v51_v47 }
0x1330   :  { %884 = vrot.lane.b32.xlu0 %v881_v40, %s1074_s2  ;;  %v882_v44 = vmul.f32 %v881_v40, %v797_v18  ;;  %913 = vmatpush.bf16.msra.mxu0 %v55_v23 }
0x13a2   :  { %v885_v37 = vpop.permute.xlu0 %884 }
0x13a3   :  { %v887_v41 = vmul.f32 %v885_v37, %v881_v40 }
0x13a5   :  { %889 = vrot.lane.b32.xlu1 %v887_v41, %s1075_s22 }
0x1417   :  { %v890_v45 = vpop.permute.xlu1 %889 }
0x1418   :  { %v892_v3 = vadd.f32 %v890_v45, %v882_v44 }
0x141a   :  { %1041 = vtanh.f32 %v892_v3 }
0x1420   :  { %v1042_v46 = vpop.eup %1041 }
0x1421   :  { %895 = vrot.lane.b32.xlu2 %v1042_v46, %s1074_s2 }
0x147b   :  { %v896_v49 = vpop.permute.xlu2 %895 }
0x147c   :  { %v898_v39 = vmul.f32 %v896_v49, %v881_v40 }
0x147e   :  { %v899_v50 = vpack.c.bf16 %v898_v39, %v898_v39 }
0x1480   :  { %901 = vrot.lane.b32.xlu0 %v899_v50, %s1075_s22 }
0x14f2   :  { %v902_v35 = vpop.permute.xlu0 %901 }
0x14f3   :  { %967 = vmatmul.msk.bf16.vlgmr.msra.gmra.mxu0 %vm142_vm5, %v902_v35 }
0x1570   :  { %v915_v42 = vpop.f32.mrf.mxu0 }
0x1571   :  { %v916_v52 = vadd.f32 %v915_v42, %v59_v43 }
0x1573   :  { %919 = vst [vmem:[%s1346_s3] sm:$0xff] %v916_v52 }
0x1578   :  { %v917_v53 = vpop.f32.mrf.mxu0 }
0x1579   :  { %924 = vsyncpa [#allocation3], 1 }

</bundles_post_ra>
